<compile_context>
chip_gen: v5e
topology: v5e:2x2
jax: 0.10.0
libtpu: 0.0.40
codegen_flags: <defaults>
</compile_context>

<pallas_src>
import jax
import jax.numpy as jnp
from jax import lax
from functools import partial
from jax.experimental import pallas as pl
from jax.experimental.pallas import tpu as pltpu

# ---- static model dims ----
N = 2                               # batch
CIN, COUT = 1, 20
KH = KW = 5
TAPS = KH * KW                      # 25
H, W = 32, 36                       # input spatial dims (so flatten size == 4480)
OH, OW = H - KH + 1, W - KW + 1     # 28, 32   (conv output)
PH, PW = OH // 2, OW // 2           # 14, 16   (avgpool output)
CONV_FLAT = OH * OW                 # 896 = 7*128 (lane-dense)
POOL_FLAT = PH * PW                 # 224
FLAT = COUT * POOL_FLAT             # 4480
K_FOLD = TAPS * POOL_FLAT           # 5600  (folded conv+pool+fc1 contraction dim)
K_PAD = 5632                        # 5600 padded to 44*128
FC1_OUT = 120
FC1_PAD = 128                       # padded to one full lane group
FC3_OUT = 10


# ---------------- fused kernel: one grid step == one block of B batch elements ----------------
def fused_forward_kernel(p1_ref, p2_ref, wc_ref, bc_ref,
                         wf_ref, b1_ref, w3_ref, b3_ref,
                         x2_ref, x9_ref, x10_ref):
    # conv1 as a single MXU matmul over im2col patches (bf16 in, f32 accumulate).
    conv = jnp.dot(wc_ref[...], p1_ref[0],
                   preferred_element_type=jnp.float32) + bc_ref[...]
    x2_ref[0] = conv                                   # (20, B*896); dropout1 == identity

    # conv + AvgPool2d + fc1 folded into ONE matmul against the pre-folded weight:
    #   x7 = (0.25 * pooled_patches) @ Wfold + b1_fold    with Wfold[t*224+p, f] = sum_c wc[c,t]*W1[c,p,f]
    x7 = jnp.dot(p2_ref[0], wf_ref[...],
                 preferred_element_type=jnp.float32) + b1_ref[...]     # (B, 128), cols 120..127 == 0
    x9_ref[0] = x7                                     # dropout3 == identity (inference)

    # fc3 (fc2's output x8 is dead in the reference graph, so it is not computed).
    x10_ref[0] = jnp.dot(x7, w3_ref[...],
                         preferred_element_type=jnp.float32) + b3_ref[...]


def _fused_call(p1, p2, wc, bc, wf, b1, w3, b3, B):
    NB = N // B
    return pl.pallas_call(
        fused_forward_kernel,
        out_shape=(
            jax.ShapeDtypeStruct((NB, COUT, B * CONV_FLAT), jnp.float32),  # x2 (batch-blocked)
            jax.ShapeDtypeStruct((NB, B, FC1_PAD), jnp.float32),           # x9 (padded to 128)
            jax.ShapeDtypeStruct((NB, B, FC3_OUT), jnp.float32),           # x10
        ),
        grid=(NB,),
        in_specs=[
            pl.BlockSpec((1, TAPS, B * CONV_FLAT), lambda n: (n, 0, 0)),   # im2col patches (bf16)
            pl.BlockSpec((1, B, K_PAD), lambda n: (n, 0, 0)),              # pooled patches, flat (bf16)
            pl.BlockSpec((COUT, TAPS), lambda n: (0, 0)),                  # conv weight (bf16)
            pl.BlockSpec((COUT, 1), lambda n: (0, 0)),                     # conv bias (f32)
            pl.BlockSpec((K_PAD, FC1_PAD), lambda n: (0, 0)),              # folded fc1 weight (bf16)
            pl.BlockSpec((1, FC1_PAD), lambda n: (0, 0)),                  # folded fc1 bias (f32)
            pl.BlockSpec((FC1_PAD, FC3_OUT), lambda n: (0, 0)),            # fc3 weight (f32, K padded)
            pl.BlockSpec((1, FC3_OUT), lambda n: (0, 0)),                  # fc3 bias (f32)
        ],
        out_specs=(
            pl.BlockSpec((1, COUT, B * CONV_FLAT), lambda n: (n, 0, 0)),
            pl.BlockSpec((1, B, FC1_PAD), lambda n: (n, 0, 0)),
            pl.BlockSpec((1, B, FC3_OUT), lambda n: (n, 0, 0)),
        ),
        compiler_params=pltpu.CompilerParams(
            dimension_semantics=("parallel",)),        # shards the batch over v7x's 2 TCs
    )(p1, p2, wc, bc, wf, b1, w3, b3)


# ---------------- wrapper-side input / weight preparation ----------------
def _build_inputs(x, B, dtype=jnp.bfloat16):
    """im2col patches for conv1, plus flattened 2x2-average-pooled patches for folded fc1."""
    NB = N // B
    # conv patches: channel ordering of conv_general_dilated_patches with C=1 is row-major (kh, kw),
    # which matches conv_w.reshape(COUT, 25).
    p1 = lax.conv_general_dilated_patches(
        x, (KH, KW), (1, 1), "VALID",
        dimension_numbers=("NCHW", "OIHW", "NCHW"),
        precision=lax.Precision.HIGHEST)                       # (N, 25, 28, 32)
    p1 = p1.reshape(NB, B, TAPS, CONV_FLAT).transpose(0, 2, 1, 3)
    p1 = p1.reshape(NB, TAPS, B * CONV_FLAT)

    # pool(conv(x)) = W @ (0.25 * strided patches of y), y[i,j] = 2x2 block sum of x at (i,j)
    y = (x[:, :, :H - 1, :W - 1] + x[:, :, 1:, :W - 1]
         + x[:, :, :H - 1, 1:] + x[:, :, 1:, 1:])              # (N, 1, 31, 35)
    p2 = lax.conv_general_dilated_patches(
        y, (KH, KW), (2, 2), "VALID",
        dimension_numbers=("NCHW", "OIHW", "NCHW"),
        precision=lax.Precision.HIGHEST)                       # (N, 25, 14, 16)
    p2 = 0.25 * p2.reshape(N, K_FOLD)                          # flat index = t*224 + (ph*16+pw)
    p2 = jnp.pad(p2, ((0, 0), (0, K_PAD - K_FOLD))).reshape(NB, B, K_PAD)
    return p1.astype(dtype), p2.astype(dtype)


def prepare_params(params, dtype=jnp.bfloat16):
    """Fold conv weight/bias through the avgpool into fc1 (done once, outside the jitted forward)."""
    conv_w, conv_b, fc1_w, fc1_b, fc3_w, fc3_b = params
    wc = conv_w.reshape(COUT, TAPS)                            # (20, 25), OIHW row-major taps
    bc = conv_b.reshape(COUT, 1)
    w1 = fc1_w.reshape(COUT, POOL_FLAT, FC1_OUT)               # torch.flatten NCHW order
    # x7[f] = sum_{t,p} p2[t,p] * Wfold[t,p,f] + b1_fold[f]
    wfold = jnp.einsum("ct,cpf->tpf", wc, w1).reshape(K_FOLD, FC1_OUT)
    b1fold = fc1_b.reshape(1, FC1_OUT) + jnp.einsum("c,cpf->f", conv_b, w1)[None, :]
    # pad K 5600->5632 and F 120->128 for lane-aligned, unmasked loads/stores
    wfold = jnp.pad(wfold, ((0, K_PAD - K_FOLD), (0, FC1_PAD - FC1_OUT)))
    b1fold = jnp.pad(b1fold, ((0, 0), (0, FC1_PAD - FC1_OUT)))
    w3 = jnp.pad(fc3_w, ((0, FC1_PAD - FC1_OUT), (0, 0)))      # (128, 10); padded rows are zero
    b3 = fc3_b.reshape(1, FC3_OUT)
    return (wc.astype(dtype), bc.astype(jnp.float32),
            wfold.astype(dtype), b1fold.astype(jnp.float32),
            w3.astype(jnp.float32), b3.astype(jnp.float32))


def pick_batch_block():
    """Batch elements per grid step: 1 on 2-TensorCore chips (v7x) so the batch shards across
    cores; the whole batch on single-TC chips (v5e/v6e) to avoid per-grid-step overhead."""
    try:
        kind = jax.devices()[0].device_kind.lower()
    except Exception:
        kind = ""
    return 1 if ("v7" in kind or "7x" in kind) else N


@partial(jax.jit, static_argnames=("batch_block",))
def model_forward(x1, kparams, batch_block=N):
    B = batch_block
    NB = N // B
    wc, bc, wfold, b1fold, w3, b3 = kparams
    p1, p2 = _build_inputs(x1, B)
    x2b, x9p, x10b = _fused_call(p1, p2, wc, bc, wfold, b1fold, w3, b3, B)
    x2 = (x2b.reshape(NB, COUT, B, CONV_FLAT)
             .transpose(0, 2, 1, 3).reshape(N, COUT, OH, OW))  # back to NCHW for returned x2
    x9 = x9p.reshape(N, FC1_PAD)[:, :FC1_OUT]
    x10 = x10b.reshape(N, FC3_OUT)
    return x2, x9, x10


# ---------------- parameters (deterministic, PyTorch-like uniform init) ----------------
def init_params(key):
    ks = jax.random.split(key, 6)

    def u(k, shape, fan_in):
        bound = 1.0 / float(fan_in) ** 0.5
        return jax.random.uniform(k, shape, jnp.float32, -bound, bound)

    conv_w = u(ks[0], (COUT, CIN, KH, KW), CIN * KH * KW)
    conv_b = u(ks[1], (COUT,), CIN * KH * KW)
    fc1_w = u(ks[2], (FLAT, FC1_OUT), FLAT)          # stored (in, out): x @ W
    fc1_b = u(ks[3], (FC1_OUT,), FLAT)
    # fc2 is dead in the reference forward (x8 unused) and is therefore not materialized.
    # TODO(synk): the reference fc3 is nn.Linear(84, 10), shape-incompatible with x9 (120
    # features) in the original forward (the PyTorch script errors); fc3 is sized (120 -> 10)
    # here so the graph is executable while keeping the dataflow exact.
    fc3_w = u(ks[4], (FC1_OUT, FC3_OUT), FC1_OUT)
    fc3_b = u(ks[5], (FC3_OUT,), FC1_OUT)
    return conv_w, conv_b, fc1_w, fc1_b, fc3_w, fc3_b


# ---------------- pure-JAX reference (numerical sanity check) ----------------
def reference_forward(x1, params):
    conv_w, conv_b, fc1_w, fc1_b, fc3_w, fc3_b = params
    x2 = lax.conv_general_dilated(
        x1, conv_w, (1, 1), "VALID",
        dimension_numbers=("NCHW", "OIHW", "NCHW"),
        precision=lax.Precision.HIGHEST) + conv_b.reshape(1, COUT, 1, 1)
    x4 = 0.25 * (x2[:, :, 0::2, 0::2] + x2[:, :, 1::2, 0::2]
                 + x2[:, :, 0::2, 1::2] + x2[:, :, 1::2, 1::2])
    x6 = x4.reshape(N, FLAT)
    x7 = jnp.dot(x6, fc1_w, precision=lax.Precision.HIGHEST) + fc1_b[None, :]
    x9 = x7
    x10 = jnp.dot(x9, fc3_w, precision=lax.Precision.HIGHEST) + fc3_b[None, :]
    return x2, x9, x10


if __name__ == "__main__":
    key = jax.random.PRNGKey(0)
    kx, kp = jax.random.split(key)
    x1 = jax.random.normal(kx, (N, CIN, H, W), jnp.float32)
    params = init_params(kp)
    kparams = prepare_params(params)
    B = pick_batch_block()

    x2, x9, x10 = model_forward(x1, kparams, batch_block=B)
    jax.block_until_ready((x2, x9, x10))

    assert x2.shape == (N, COUT, OH, OW)
    assert x9.shape == (N, FC1_OUT)
    assert x10.shape == (N, FC3_OUT)

    # numerical sanity check against a pure-JAX f32 reference (kernel uses bf16 inputs/weights
    # with f32 accumulation, so allow a slightly loosened tolerance)
    r2, r9, r10 = reference_forward(x1, params)
    assert bool(jnp.allclose(x2, r2, atol=2e-2, rtol=2e-2)), "conv output mismatch"
    assert bool(jnp.allclose(x9, r9, atol=2e-2, rtol=2e-2)), "fc1 output mismatch"
    assert bool(jnp.allclose(x10, r10, atol=2e-2, rtol=2e-2)), "fc3 output mismatch"

    print("KERNEL_OK")
</pallas_src>

<mosaic_0001>
module attributes {stable_mosaic.version = 11 : i64} {
  func.func @fused_forward_kernel(%arg0: i32, %arg1: memref<1x25x1792xbf16, #tpu.memory_space<vmem>>, %arg2: memref<1x2x5632xbf16, #tpu.memory_space<vmem>>, %arg3: memref<20x25xbf16, #tpu.memory_space<vmem>>, %arg4: memref<20x1xf32, #tpu.memory_space<vmem>>, %arg5: memref<5632x128xbf16, #tpu.memory_space<vmem>>, %arg6: memref<1x128xf32, #tpu.memory_space<vmem>>, %arg7: memref<128x10xf32, #tpu.memory_space<vmem>>, %arg8: memref<1x10xf32, #tpu.memory_space<vmem>>, %arg9: memref<1x20x1792xf32, #tpu.memory_space<vmem>>, %arg10: memref<1x2x128xf32, #tpu.memory_space<vmem>>, %arg11: memref<1x2x10xf32, #tpu.memory_space<vmem>>) attributes {dimension_semantics = [#tpu.dimension_semantics<parallel>], iteration_bounds = array<i64: 1>, scalar_prefetch = 0 : i64, scratch_operands = 0 : i64, tpu.core_type = #tpu.core_type<tc>, window_params = [{transform_indices = @transform_0, window_bounds = array<i64: 1, 25, 1792>}, {transform_indices = @transform_1, window_bounds = array<i64: 1, 2, 5632>}, {pipeline_mode = #tpu.pipeline_mode<synchronous>, transform_indices = @transform_2, window_bounds = array<i64: 20, 25>}, {pipeline_mode = #tpu.pipeline_mode<synchronous>, transform_indices = @transform_3, window_bounds = array<i64: 20, 1>}, {pipeline_mode = #tpu.pipeline_mode<synchronous>, transform_indices = @transform_4, window_bounds = array<i64: 5632, 128>}, {pipeline_mode = #tpu.pipeline_mode<synchronous>, transform_indices = @transform_5, window_bounds = array<i64: 1, 128>}, {pipeline_mode = #tpu.pipeline_mode<synchronous>, transform_indices = @transform_6, window_bounds = array<i64: 128, 10>}, {pipeline_mode = #tpu.pipeline_mode<synchronous>, transform_indices = @transform_7, window_bounds = array<i64: 1, 10>}, {transform_indices = @transform_8, window_bounds = array<i64: 1, 20, 1792>}, {transform_indices = @transform_9, window_bounds = array<i64: 1, 2, 128>}, {transform_indices = @transform_10, window_bounds = array<i64: 1, 2, 10>}]} {
    %c0 = arith.constant 0 : index
    %c0_0 = arith.constant 0 : index
    %0 = vector.load %arg3[%c0, %c0_0] : memref<20x25xbf16, #tpu.memory_space<vmem>>, vector<20x25xbf16>
    %c0_1 = arith.constant 0 : index
    %c0_2 = arith.constant 0 : index
    %c0_3 = arith.constant 0 : index
    %1 = vector.load %arg1[%c0_1, %c0_2, %c0_3] : memref<1x25x1792xbf16, #tpu.memory_space<vmem>>, vector<1x25x1792xbf16>
    %2 = vector.shape_cast %1 : vector<1x25x1792xbf16> to vector<25x1792xbf16>
    %cst = arith.constant dense<0.000000e+00> : vector<20x1792xf32>
    %3 = tpu.matmul %0, %2, %cst {dimension_numbers = #tpu.dot_dimension_numbers<[1], [0], [0], [1], [0, 0, 1, 1], [], []>} : vector<20x25xbf16>, vector<25x1792xbf16>, vector<20x1792xf32> -> vector<20x1792xf32>
    %c0_4 = arith.constant 0 : index
    %c0_5 = arith.constant 0 : index
    %4 = vector.load %arg4[%c0_4, %c0_5] : memref<20x1xf32, #tpu.memory_space<vmem>>, vector<20x1xf32>
    %5 = vector.broadcast %4 : vector<20x1xf32> to vector<20x1792xf32>
    %6 = arith.addf %3, %5 : vector<20x1792xf32>
    %c0_6 = arith.constant 0 : index
    %c0_7 = arith.constant 0 : index
    %c0_8 = arith.constant 0 : index
    %7 = vector.load %arg9[%c0_6, %c0_7, %c0_8] : memref<1x20x1792xf32, #tpu.memory_space<vmem>>, vector<1x20x1792xf32>
    %8 = vector.shape_cast %7 : vector<1x20x1792xf32> to vector<20x1792xf32>
    %9 = vector.shape_cast %6 : vector<20x1792xf32> to vector<1x20x1792xf32>
    tpu.vector_store %arg9[%c0_6, %c0_7, %c0_8], %9 {strides = array<i32>} : memref<1x20x1792xf32, #tpu.memory_space<vmem>>, vector<1x20x1792xf32>,
    %c0_9 = arith.constant 0 : index
    %c0_10 = arith.constant 0 : index
    %c0_11 = arith.constant 0 : index
    %10 = vector.load %arg2[%c0_9, %c0_10, %c0_11] : memref<1x2x5632xbf16, #tpu.memory_space<vmem>>, vector<1x2x5632xbf16>
    %11 = vector.shape_cast %10 : vector<1x2x5632xbf16> to vector<2x5632xbf16>
    %c0_12 = arith.constant 0 : index
    %c0_13 = arith.constant 0 : index
    %12 = vector.load %arg5[%c0_12, %c0_13] : memref<5632x128xbf16, #tpu.memory_space<vmem>>, vector<5632x128xbf16>
    %cst_14 = arith.constant dense<0.000000e+00> : vector<2x128xf32>
    %13 = tpu.matmul %11, %12, %cst_14 {dimension_numbers = #tpu.dot_dimension_numbers<[1], [0], [0], [1], [0, 0, 1, 1], [], []>} : vector<2x5632xbf16>, vector<5632x128xbf16>, vector<2x128xf32> -> vector<2x128xf32>
    %c0_15 = arith.constant 0 : index
    %c0_16 = arith.constant 0 : index
    %14 = vector.load %arg6[%c0_15, %c0_16] : memref<1x128xf32, #tpu.memory_space<vmem>>, vector<1x128xf32>
    %15 = vector.broadcast %14 : vector<1x128xf32> to vector<2x128xf32>
    %16 = arith.addf %13, %15 : vector<2x128xf32>
    %c0_17 = arith.constant 0 : index
    %c0_18 = arith.constant 0 : index
    %c0_19 = arith.constant 0 : index
    %17 = vector.load %arg10[%c0_17, %c0_18, %c0_19] : memref<1x2x128xf32, #tpu.memory_space<vmem>>, vector<1x2x128xf32>
    %18 = vector.shape_cast %17 : vector<1x2x128xf32> to vector<2x128xf32>
    %19 = vector.shape_cast %16 : vector<2x128xf32> to vector<1x2x128xf32>
    tpu.vector_store %arg10[%c0_17, %c0_18, %c0_19], %19 {strides = array<i32>} : memref<1x2x128xf32, #tpu.memory_space<vmem>>, vector<1x2x128xf32>,
    %c0_20 = arith.constant 0 : index
    %c0_21 = arith.constant 0 : index
    %20 = vector.load %arg7[%c0_20, %c0_21] : memref<128x10xf32, #tpu.memory_space<vmem>>, vector<128x10xf32>
    %cst_22 = arith.constant dense<0.000000e+00> : vector<2x10xf32>
    %21 = tpu.matmul %16, %20, %cst_22 {dimension_numbers = #tpu.dot_dimension_numbers<[1], [0], [0], [1], [0, 0, 1, 1], [], []>} : vector<2x128xf32>, vector<128x10xf32>, vector<2x10xf32> -> vector<2x10xf32>
    %c0_23 = arith.constant 0 : index
    %c0_24 = arith.constant 0 : index
    %22 = vector.load %arg8[%c0_23, %c0_24] : memref<1x10xf32, #tpu.memory_space<vmem>>, vector<1x10xf32>
    %23 = vector.broadcast %22 : vector<1x10xf32> to vector<2x10xf32>
    %24 = arith.addf %21, %23 : vector<2x10xf32>
    %c0_25 = arith.constant 0 : index
    %c0_26 = arith.constant 0 : index
    %c0_27 = arith.constant 0 : index
    %25 = vector.load %arg11[%c0_25, %c0_26, %c0_27] : memref<1x2x10xf32, #tpu.memory_space<vmem>>, vector<1x2x10xf32>
    %26 = vector.shape_cast %25 : vector<1x2x10xf32> to vector<2x10xf32>
    %27 = vector.shape_cast %24 : vector<2x10xf32> to vector<1x2x10xf32>
    tpu.vector_store %arg11[%c0_25, %c0_26, %c0_27], %27 {strides = array<i32>} : memref<1x2x10xf32, #tpu.memory_space<vmem>>, vector<1x2x10xf32>,
    return
  }
  func.func @transform_0(%arg0: i32) -> (i32, i32, i32) {
    %c0_i32 = arith.constant 0 : i32
    %c0_i32_0 = arith.constant 0 : i32
    %c0_i32_1 = arith.constant 0 : i32
    return %arg0, %c0_i32, %c0_i32_0 : i32, i32, i32
  }
  func.func @transform_1(%arg0: i32) -> (i32, i32, i32) {
    %c0_i32 = arith.constant 0 : i32
    %c0_i32_0 = arith.constant 0 : i32
    %c0_i32_1 = arith.constant 0 : i32
    return %arg0, %c0_i32, %c0_i32_0 : i32, i32, i32
  }
  func.func @transform_2(%arg0: i32) -> (i32, i32) {
    %c0_i32 = arith.constant 0 : i32
    %c0_i32_0 = arith.constant 0 : i32
    %c0_i32_1 = arith.constant 0 : i32
    return %c0_i32, %c0_i32_0 : i32, i32
  }
  func.func @transform_3(%arg0: i32) -> (i32, i32) {
    %c0_i32 = arith.constant 0 : i32
    %c0_i32_0 = arith.constant 0 : i32
    %c0_i32_1 = arith.constant 0 : i32
    return %c0_i32, %c0_i32_0 : i32, i32
  }
  func.func @transform_4(%arg0: i32) -> (i32, i32) {
    %c0_i32 = arith.constant 0 : i32
    %c0_i32_0 = arith.constant 0 : i32
    %c0_i32_1 = arith.constant 0 : i32
    return %c0_i32, %c0_i32_0 : i32, i32
  }
  func.func @transform_5(%arg0: i32) -> (i32, i32) {
    %c0_i32 = arith.constant 0 : i32
    %c0_i32_0 = arith.constant 0 : i32
    %c0_i32_1 = arith.constant 0 : i32
    return %c0_i32, %c0_i32_0 : i32, i32
  }
  func.func @transform_6(%arg0: i32) -> (i32, i32) {
    %c0_i32 = arith.constant 0 : i32
    %c0_i32_0 = arith.constant 0 : i32
    %c0_i32_1 = arith.constant 0 : i32
    return %c0_i32, %c0_i32_0 : i32, i32
  }
  func.func @transform_7(%arg0: i32) -> (i32, i32) {
    %c0_i32 = arith.constant 0 : i32
    %c0_i32_0 = arith.constant 0 : i32
    %c0_i32_1 = arith.constant 0 : i32
    return %c0_i32, %c0_i32_0 : i32, i32
  }
  func.func @transform_8(%arg0: i32) -> (i32, i32, i32) {
    %c0_i32 = arith.constant 0 : i32
    %c0_i32_0 = arith.constant 0 : i32
    %c0_i32_1 = arith.constant 0 : i32
    return %arg0, %c0_i32, %c0_i32_0 : i32, i32, i32
  }
  func.func @transform_9(%arg0: i32) -> (i32, i32, i32) {
    %c0_i32 = arith.constant 0 : i32
    %c0_i32_0 = arith.constant 0 : i32
    %c0_i32_1 = arith.constant 0 : i32
    return %arg0, %c0_i32, %c0_i32_0 : i32, i32, i32
  }
  func.func @transform_10(%arg0: i32) -> (i32, i32, i32) {
    %c0_i32 = arith.constant 0 : i32
    %c0_i32_0 = arith.constant 0 : i32
    %c0_i32_1 = arith.constant 0 : i32
    return %arg0, %c0_i32, %c0_i32_0 : i32, i32, i32
  }
}

</mosaic_0001>

<bundles_post_ra>
// kernel: model_forward.1
= control target key start
LH: loop header
LB: loop body
LE: loop exit
PB: predicated region body
PF: predicated region fallthrough
CT: control target
= control target key end

     0   :  { %16 = vsyncpa [#allocation3], 0  ;;  %vm225_vm0 = vcmask 1043456   ;;  %vm226_vm1 = vcmask 1044480   ;;  %v6137_v5 = vmov 65535   ;;  %v6138_v19 = vmov 0   ;;  %s7811_s0 = inlined_call_operand.vmem [shape: bf16[1,25,1792], index: 0, kind: input, shape index: {}]   ;;  %s7812_s1 = inlined_call_operand.vmem [shape: bf16[1,2,5632], index: 1, kind: input, shape index: {}]   ;;  %s7813_s2 = inlined_call_operand.vmem [shape: bf16[20,25], index: 2, kind: input, shape index: {}]   ;;  %s7814_s3 = inlined_call_operand.vmem [shape: f32[20,1], index: 3, kind: input, shape index: {}]   ;;  %s7815_s4 = inlined_call_operand.vmem [shape: bf16[5632,128], index: 4, kind: input, shape index: {}]   ;;  %s7816_s5 = inlined_call_operand.vmem [shape: f32[1,128], index: 5, kind: input, shape index: {}]   ;;  %s7817_s6 = inlined_call_operand.vmem [shape: f32[128,10], index: 6, kind: input, shape index: {}]   ;;  %s7818_s7 = inlined_call_operand.vmem [shape: f32[1,10], index: 7, kind: input, shape index: {}]   ;;  %s7819_s8 = inlined_call_operand.vmem [shape: f32[1,20,1792], index: 8, kind: output, shape index: {0}]   ;;  %s7820_s9 = inlined_call_operand.hbm [shape: f32[1,2,128], index: 9, kind: output, shape index: {1}]   ;;  %s7821_s10 = inlined_call_operand.hbm [shape: f32[1,2,10], index: 10, kind: output, shape index: {2}]  }
   0x1   :  { %v4204_v0 = vld [vmem:[%s7811_s0 + $0x70] sm:$0xf]  ;;  %v5716_v1 = vld [vmem:[%s7811_s0 + $0xa4] sm:$0x10]  ;;  %v5709_v3 = vld [vmem:[%s7811_s0 + $0x74] sm:$0xf]  ;;  %6081 = vset.pattern.permute.xlu0 %v6138_v19  ;;  %6082 = vset.pattern.permute.xlu1 %v6138_v19 }
   0x2   :  { %v4205_v2 = vor.u32 %v5716_v1, %v4204_v0  ;;  %v4206_v4 = vld [vmem:[%s7811_s0 + $0xa8] sm:$0x10]  ;;  %v227_v6 = vsel %vm225_vm0, 4294967295, %v6137_v5  ;;  %v4212_v8 = vld [vmem:[%s7811_s0 + $0x78] sm:$0xf]  ;;  %v66_v28 = vld [vmem:[%s7814_s3] sm:$0xff] }
   0x3   :  { %v4209_v7 = vor.u32 %v5709_v3, %v4206_v4  ;;  %v5717_v9 = vld [vmem:[%s7811_s0 + $0xac] sm:$0x10]  ;;  %v6214_v10 = vsel %vm226_vm1, %v227_v6, 0  ;;  %v4148_v12 = vld [vmem:[%s7811_s0] sm:$0xf]  ;;  %vm218_vm2 = vcmask 203776   ;;  %71 = vperm.xlu0 %6081, %v66_v28  }
   0x4   :  { %v4213_v11 = vor.u32 %v5717_v9, %v4212_v8  ;;  %v5702_v13 = vld [vmem:[%s7811_s0 + $0x34] sm:$0xf0]  ;;  %v230_v14 = vand.u32 %v4205_v2, %v6214_v10  ;;  %v5695_v16 = vld [vmem:[%s7811_s0 + $0x4] sm:$0xf]  ;;  %v4150_v17 = vld [vmem:[%s7811_s0 + $0x38] sm:$0xf0] }
   0x5   :  { %v233_v15 = vand.u32 %v4209_v7, %v6214_v10  ;;  %v4156_v18 = vld [vmem:[%s7811_s0 + $0x8] sm:$0xf]  ;;  %v5703_v21 = vld [vmem:[%s7811_s0 + $0x3c] sm:$0xf0]  ;;  %v5710_v23 = vld [vmem:[%s7811_s0 + $0x7c] sm:$0xf]  ;;  %v4149_v24 = vor.u32 %v5702_v13, %v4148_v12  ;;  %v4153_v25 = vor.u32 %v5695_v16, %v4150_v17 }
   0x6   :  { %v236_v20 = vand.u32 %v4213_v11, %v6214_v10  ;;  %v37_v22 = vld [vmem:[%s7813_s2 + $0x8] sm:$0x3]  ;;  %6075 = vmatpush.bf16.msra.mxu3 %v230_v14  ;;  %v4214_v27 = vld [vmem:[%s7811_s0 + $0xb0] sm:$0x10]  ;;  %v4157_v29 = vor.u32 %v5703_v21, %v4156_v18  ;;  %277 = vmatpush.bf16.msra.mxu0 %v230_v14  ;;  %v4220_v31 = vld [vmem:[%s7811_s0 + $0x80] sm:$0xf] }
   0x7   :  { %295 = vmatpush.bf16.msra.mxu1 %v233_v15  ;;  %v89_v26 = vunpack.c.l.b16 %v37_v22  ;;  %v4217_v30 = vor.u32 %v5710_v23, %v4214_v27  ;;  %v5718_v32 = vld [vmem:[%s7811_s0 + $0xb4] sm:$0x10]  ;;  %v6258_v33 = vld [vmem:[%s7813_s2] sm:$0xff]  ;;  %v5696_v34 = vld [vmem:[%s7811_s0 + $0xc] sm:$0xf] }
   0x8   :  { %313 = vmatpush.bf16.msra.mxu2 %v236_v20  ;;  %v4158_v35 = vld [vmem:[%s7811_s0 + $0x40] sm:$0xf0]  ;;  %v4221_v36 = vor.u32 %v5718_v32, %v4220_v31  ;;  %v4164_v39 = vld [vmem:[%s7811_s0 + $0x10] sm:$0xf]  ;;  %v4222_v41 = vld [vmem:[%s7811_s0 + $0xb8] sm:$0x10] }
   0x9   :  { %v6266_v37 = vpack.c.b16 %v89_v26, %v89_v26  ;;  %v239_v38 = vand.u32 %v4217_v30, %v6214_v10  ;;  %v5711_v40 = vld [vmem:[%s7811_s0 + $0x84] sm:$0xf]  ;;  %v5704_v43 = vld [vmem:[%s7811_s0 + $0x44] sm:$0xf0]  ;;  %v5719_v46 = vld [vmem:[%s7811_s0 + $0xbc] sm:$0x10]  ;;  %v4161_v51 = vor.u32 %v5696_v34, %v4158_v35 }
   0xa   :  { %6076 = vmatpush.bf16.msra.mxu3 %v4149_v24  ;;  %v242_v42 = vand.u32 %v4221_v36, %v6214_v10  ;;  %v4225_v44 = vor.u32 %v5711_v40, %v4222_v41  ;;  %v4228_v45 = vld [vmem:[%s7811_s0 + $0x88] sm:$0xf]  ;;  %278 = vmatpush.bf16.msra.mxu0 %v4149_v24  ;;  %v68_v47 = vld [vmem:[%s7814_s3 + $0x10] sm:$0xf]  ;;  %v5697_v49 = vld [vmem:[%s7811_s0 + $0x14] sm:$0xf]  ;;  %v4165_v56 = vor.u32 %v5704_v43, %v4164_v39 }
   0xb   :  { %296 = vmatpush.bf16.msra.mxu1 %v4153_v25  ;;  %v4229_v48 = vor.u32 %v5719_v46, %v4228_v45  ;;  %v4166_v50 = vld [vmem:[%s7811_s0 + $0x48] sm:$0xf0]  ;;  %v4244_v53 = vld [vmem:[%s7811_s0 + $0x98] sm:$0xf]  ;;  %v5721_v54 = vld [vmem:[%s7811_s0 + $0xcc] sm:$0x10] }
   0xc   :  { %314 = vmatpush.bf16.msra.mxu2 %v4157_v29  ;;  %v245_v52 = vand.u32 %v4225_v44, %v6214_v10  ;;  %v67_v55 = vld [vmem:[%s7814_s3 + $0x8] sm:$0xff] }
   0xd   :  { %4259 = vmatmul.msk.bf16.vlgmr.msra.gmra.mxu3 %vm218_vm2, %v6266_v37  ;;  %v248_v57 = vand.u32 %v4229_v48, %v6214_v10 }
   0xe   :  { %331 = vmatpush.bf16.msrb.mxu3 %v239_v38  ;;  %349 = vmatpush.bf16.msrb.mxu0 %v242_v42 }
   0xf   :  { %4260 = vmatmul.msk.bf16.vlgmr.msra.gmra.mxu1 %vm218_vm2, %v6258_v33 }
  0x10   :  { %17 = vsyncpa [#allocation5], 0  ;;  %4262 = vmatmul.msk.bf16.vlgmr.msra.gmra.mxu2 %vm218_vm2, %v6258_v33  ;;  %4258 = vmatmul.msk.bf16.vlgmr.msra.gmra.mxu0 %vm218_vm2, %v6258_v33  ;;  %v4172_v58 = vld [vmem:[%s7811_s0 + $0x18] sm:$0xf]  ;;  %v5705_v59 = vld [vmem:[%s7811_s0 + $0x4c] sm:$0xf0]  ;;  %v4245_v60 = vor.u32 %v5721_v54, %v4244_v53  ;;  %v4169_v61 = vor.u32 %v5697_v49, %v4166_v50 }
  0x11   :  { %81 = vperm.xlu1 %6082, %v68_v47   ;;  %367 = vmatpush.bf16.msrb.mxu1 %v245_v52  ;;  %v5712_v62 = vld [vmem:[%s7811_s0 + $0x8c] sm:$0xf]  ;;  %v4230_v63 = vld [vmem:[%s7811_s0 + $0xc0] sm:$0x10]  ;;  %v4173_v1 = vor.u32 %v5705_v59, %v4172_v58  ;;  %v4188_v3 = vld [vmem:[%s7811_s0 + $0x28] sm:$0xf] }
  0x12   :  { %332 = vmatpush.bf16.msrb.mxu3 %v4161_v51  ;;  %76 = vperm.xlu0 %6081, %v67_v55   ;;  %v4233_v0 = vor.u32 %v5712_v62, %v4230_v63  ;;  %v260_v2 = vand.u32 %v4245_v60, %v6214_v10  ;;  %v5707_v5 = vld [vmem:[%s7811_s0 + $0x5c] sm:$0xf0]  ;;  %v5698_v6 = vld [vmem:[%s7811_s0 + $0x1c] sm:$0xf]  ;;  %v4174_v7 = vld [vmem:[%s7811_s0 + $0x50] sm:$0xf0] }
  0x13   :  { %350 = vmatpush.bf16.msrb.mxu0 %v4165_v56  ;;  %385 = vmatpush.bf16.msrb.mxu2 %v248_v57  ;;  %v4177_v8 = vor.u32 %v5698_v6, %v4174_v7  ;;  %v4189_v9 = vor.u32 %v5707_v5, %v4188_v3  ;;  %v4236_v11 = vld [vmem:[%s7811_s0 + $0x90] sm:$0xf]  ;;  %v5720_v12 = vld [vmem:[%s7811_s0 + $0xc4] sm:$0x10]  ;;  %v5714_v15 = vld [vmem:[%s7811_s0 + $0x9c] sm:$0xf] }
  0x14   :  { %v251_v4 = vand.u32 %v4233_v0, %v6214_v10  ;;  %v4237_v13 = vor.u32 %v5720_v12, %v4236_v11  ;;  %v4246_v16 = vld [vmem:[%s7811_s0 + $0xd0] sm:$0x10]  ;;  %v4180_v19 = vld [vmem:[%s7811_s0 + $0x20] sm:$0xf]  ;;  %v5706_v20 = vld [vmem:[%s7811_s0 + $0x54] sm:$0xf0] }
  0x15   :  { %368 = vmatpush.bf16.msrb.mxu1 %v4169_v61  ;;  %v4249_v17 = vor.u32 %v5714_v15, %v4246_v16  ;;  %v4181_v21 = vor.u32 %v5706_v20, %v4180_v19  ;;  %v5700_v22 = vld [vmem:[%s7811_s0 + $0x2c] sm:$0xf]  ;;  %v4190_v23 = vld [vmem:[%s7811_s0 + $0x60] sm:$0xf0]  ;;  %v4252_v25 = vld [vmem:[%s7811_s0 + $0xa0] sm:$0xf] }
  0x16   :  { %403 = vmatpush.bf16.msra.mxu3 %v251_v4  ;;  %v254_v14 = vand.u32 %v4237_v13, %v6214_v10  ;;  %v4193_v24 = vor.u32 %v5700_v22, %v4190_v23  ;;  %v5722_v26 = vld [vmem:[%s7811_s0 + $0xd4] sm:$0x10]  ;;  %v5713_v28 = vld [vmem:[%s7811_s0 + $0x94] sm:$0xf]  ;;  %v4238_v29 = vld [vmem:[%s7811_s0 + $0xc8] sm:$0x10] }
  0x17   :  { %386 = vmatpush.bf16.msrb.mxu2 %v4173_v1  ;;  %v263_v18 = vand.u32 %v4249_v17, %v6214_v10  ;;  %v4253_v27 = vor.u32 %v5722_v26, %v4252_v25  ;;  %v4241_v30 = vor.u32 %v5713_v28, %v4238_v29  ;;  %v4196_v32 = vld [vmem:[%s7811_s0 + $0x30] sm:$0xf]  ;;  %v5708_v34 = vld [vmem:[%s7811_s0 + $0x64] sm:$0xf0]  ;;  %v5699_v36 = vld [vmem:[%s7811_s0 + $0x24] sm:$0xf] }
  0x18   :  { %421 = vmatpush.bf16.msra.mxu0 %v254_v14  ;;  %v4182_v38 = vld [vmem:[%s7811_s0 + $0x58] sm:$0xf0]  ;;  %v4197_v39 = vor.u32 %v5708_v34, %v4196_v32  ;;  %v5715_v41 = vld [vmem:[%s7811_s0 + $0xa4] sm:$0xf]  ;;  %v5729_v46 = vld [vmem:[%s7815_s4 + $0x30] sm:$0xff]  ;;  %s4115_s25 = sshll.u32 %s7820_s9, 4  ;;  %s4116_s25 = int_to_ptr.hbm [resolvable:$true] %s4115_s25 }
  0x19   :  { %v266_v31 = vand.u32 %v4253_v27, %v6214_v10  ;;  %v257_v35 = vand.u32 %v4241_v30, %v6214_v10  ;;  %v4185_v40 = vor.u32 %v5699_v36, %v4182_v38  ;;  %v4254_v42 = vld [vmem:[%s7811_s0 + $0xd8] sm:$0x10]  ;;  %v5701_v47 = vld [vmem:[%s7811_s0 + $0x34] sm:$0xf]  ;;  %v5728_v49 = vld [vmem:[%s7815_s4 + $0x28] sm:$0xff]  ;;  %s6140_s28 = smov [#allocation4]  }
  0x1a   :  { %404 = vmatpush.bf16.msra.mxu3 %v4177_v8  ;;  %v5730_v43 = vld [vmem:[%s7815_s4 + $0x38] sm:$0xff]  ;;  %v4257_v44 = vor.u32 %v5715_v41, %v4254_v42  ;;  %v5727_v50 = vld [vmem:[%s7815_s4 + $0x20] sm:$0xff]  ;;  %v5725_v54 = vld [vmem:[%s7815_s4 + $0x10] sm:$0xff]  ;;  %s4124_s29 = sshll.u32 %s6140_s28, 4  ;;  %s4126_s12 = sshll.u32 %s7821_s10, 4  ;;  %vm4104_vm3 = vcmask 74752   ;;  %s4125_s29 = int_to_ptr.vmem [resolvable:$true] %s4124_s29  ;;  %s4127_s12 = int_to_ptr.hbm [resolvable:$true] %s4126_s12 }
  0x1b   :  { %457 = vmatpush.bf16.msra.mxu2 %v260_v2  ;;  %439 = vmatpush.bf16.msra.mxu1 %v257_v35  ;;  %v5726_v51 = vld [vmem:[%s7815_s4 + $0x18] sm:$0xff]  ;;  %v5737_v55 = vld [vmem:[%s7815_s4 + $0x70] sm:$0xff]  ;;  %v5724_v57 = vld [vmem:[%s7815_s4 + $0x8] sm:$0xff] }
  0x1c   :  { %422 = vmatpush.bf16.msra.mxu0 %v4181_v21  ;;  %v269_v45 = vand.u32 %v4257_v44, %v6214_v10  ;;  %v4198_v10 = vld [vmem:[%s7811_s0 + $0x68] sm:$0xf0]  ;;  %v5738_v52 = vld [vmem:[%s7815_s4 + $0x78] sm:$0xff]  ;;  %v5745_v56 = vld [vmem:[%s7815_s4 + $0xb0] sm:$0xff] }
  0x1d   :  { %4264 = vmatmul.msk.bf16.vlgmr.msrb.gmra.mxu3 %vm218_vm2, %v6258_v33  ;;  %v4201_v48 = vor.u32 %v5701_v47, %v4198_v10  ;;  %v5746_v53 = vld [vmem:[%s7815_s4 + $0xb8] sm:$0xff]  ;;  %v5736_v58 = vld [vmem:[%s7815_s4 + $0x68] sm:$0xff]  ;;  %v565_v60 = vld [vmem:[%s7812_s1] sm:$0xff] }
  0x1e   :  { %475 = vmatpush.bf16.msrb.mxu3 %v263_v18  ;;  %v5744_v59 = vld [vmem:[%s7815_s4 + $0xa8] sm:$0xff]  ;;  %1280 = vst [vmem:[#allocation1] ss:$9 sm:$0xff] %v565_v60  ;;  %v5723_v61 = vld [vmem:[%s7815_s4] sm:$0xff]  ;;  %v5762_v0 = vld [vmem:[%s7815_s4 + $0x138] sm:$0xff] }
  0x1f   :  { %458 = vmatpush.bf16.msra.mxu2 %v4189_v9  ;;  %4261 = vmatmul.msk.bf16.gmra.mxu1 %vm218_vm2, %v6266_v37  ;;  %v5735_v62 = vld [vmem:[%s7815_s4 + $0x60] sm:$0xff]  ;;  %v5734_v1 = vld [vmem:[%s7815_s4 + $0x58] sm:$0xff]  ;;  %v5761_v4 = vld [vmem:[%s7815_s4 + $0x130] sm:$0xff] }
  0x20   :  { %4263 = vmatmul.msk.bf16.gmra.mxu2 %vm218_vm2, %v6266_v37  ;;  %4266 = vmatmul.msk.bf16.vlgmr.msrb.gmra.mxu0 %vm218_vm2, %v6258_v33  ;;  %v5743_v63 = vld [vmem:[%s7815_s4 + $0xa0] sm:$0xff]  ;;  %v5754_v2 = vld [vmem:[%s7815_s4 + $0xf8] sm:$0xff]  ;;  %v5733_v5 = vld [vmem:[%s7815_s4 + $0x50] sm:$0xff] }
  0x21   :  { %493 = vmatpush.bf16.msrb.mxu0 %v266_v31  ;;  %440 = vmatpush.bf16.msra.mxu1 %v4185_v40  ;;  %v5742_v3 = vld [vmem:[%s7815_s4 + $0x98] sm:$0xff]  ;;  %v5753_v6 = vld [vmem:[%s7815_s4 + $0xf0] sm:$0xff]  ;;  %v5760_v8 = vld [vmem:[%s7815_s4 + $0x128] sm:$0xff] }
  0x22   :  { %476 = vmatpush.bf16.msrb.mxu3 %v4193_v24  ;;  %v5741_v7 = vld [vmem:[%s7815_s4 + $0x90] sm:$0xff]  ;;  %v5732_v9 = vld [vmem:[%s7815_s4 + $0x48] sm:$0xff]  ;;  %v5759_v13 = vld [vmem:[%s7815_s4 + $0x120] sm:$0xff] }
  0x23   :  { %v5752_v11 = vld [vmem:[%s7815_s4 + $0xe8] sm:$0xff]  ;;  %v5731_v14 = vld [vmem:[%s7815_s4 + $0x40] sm:$0xff]  ;;  %v5770_v17 = vld [vmem:[%s7815_s4 + $0x178] sm:$0xff] }
  0x24   :  { %v5740_v12 = vld [vmem:[%s7815_s4 + $0x88] sm:$0xff]  ;;  %v5751_v15 = vld [vmem:[%s7815_s4 + $0xe0] sm:$0xff]  ;;  %v5758_v18 = vld [vmem:[%s7815_s4 + $0x118] sm:$0xff] }
  0x25   :  { %494 = vmatpush.bf16.msrb.mxu0 %v4197_v39  ;;  %v5739_v16 = vld [vmem:[%s7815_s4 + $0x80] sm:$0xff]  ;;  %v5750_v19 = vld [vmem:[%s7815_s4 + $0xd8] sm:$0xff]  ;;  %v5769_v21 = vld [vmem:[%s7815_s4 + $0x170] sm:$0xff] }
  0x26   :  { %v5778_v20 = vld [vmem:[%s7815_s4 + $0x1b8] sm:$0xff]  ;;  %v5757_v22 = vld [vmem:[%s7815_s4 + $0x110] sm:$0xff]  ;;  %v5768_v25 = vld [vmem:[%s7815_s4 + $0x168] sm:$0xff] }
  0x27   :  { %v5749_v23 = vld [vmem:[%s7815_s4 + $0xd0] sm:$0xff]  ;;  %v5756_v26 = vld [vmem:[%s7815_s4 + $0x108] sm:$0xff]  ;;  %v5767_v29 = vld [vmem:[%s7815_s4 + $0x160] sm:$0xff] }
  0x28   :  { %v5777_v24 = vld [vmem:[%s7815_s4 + $0x1b0] sm:$0xff]  ;;  %v5748_v27 = vld [vmem:[%s7815_s4 + $0xc8] sm:$0xff]  ;;  %v5755_v30 = vld [vmem:[%s7815_s4 + $0x100] sm:$0xff] }
  0x29   :  { %v5776_v28 = vld [vmem:[%s7815_s4 + $0x1a8] sm:$0xff]  ;;  %v5747_v31 = vld [vmem:[%s7815_s4 + $0xc0] sm:$0xff]  ;;  %v5766_v34 = vld [vmem:[%s7815_s4 + $0x158] sm:$0xff] }
  0x2a   :  { %v5775_v32 = vld [vmem:[%s7815_s4 + $0x1a0] sm:$0xff]  ;;  %v5794_v36 = vld [vmem:[%s7815_s4 + $0x238] sm:$0xff]  ;;  %v5765_v40 = vld [vmem:[%s7815_s4 + $0x150] sm:$0xff] }
  0x2b   :  { %v1281_v35 = vld [vmem:[#allocation1] sm:$0xff]  ;;  %v5786_v38 = vld [vmem:[%s7815_s4 + $0x1f8] sm:$0xff]  ;;  %v5793_v41 = vld [vmem:[%s7815_s4 + $0x230] sm:$0xff] }
  0x2c   :  { %v5774_v39 = vld [vmem:[%s7815_s4 + $0x198] sm:$0xff]  ;;  %v5764_v42 = vld [vmem:[%s7815_s4 + $0x148] sm:$0xff] }
  0x2d   :  { %4265 = vmatmul.msk.bf16.gmra.mxu3 %vm218_vm2, %v6266_v37  ;;  %v5784_v44 = vld [vmem:[%s7815_s4 + $0x1e8] sm:$0xff]  ;;  %v1283_v47 = vld [vmem:[#allocation1 + $0x12] sm:$0xff] }
  0x2e   :  { %v1285_v10 = vld [vmem:[#allocation1 + $0x24] sm:$0xff]  ;;  %v5782_v60 = vld [vmem:[%s7815_s4 + $0x1d8] sm:$0xff] }
  0x2f   :  { %4268 = vmatmul.msk.bf16.vlgmr.msrb.gmra.mxu1 %vm218_vm2, %v6258_v33 }
  0x30   :  { %4270 = vmatmul.msk.bf16.vlgmr.msrb.gmra.mxu2 %vm218_vm2, %v6258_v33  ;;  %4267 = vmatmul.msk.bf16.gmra.mxu0 %vm218_vm2, %v6266_v37 }
  0x31   :  { %3491 = vmatpush.bf16.msrb.mxu2 %v5730_v43  ;;  %511 = vmatpush.bf16.msrb.mxu1 %v269_v45  ;;  %v5792_v43 = vld [vmem:[%s7815_s4 + $0x228] sm:$0xff]  ;;  %v5773_v45 = vld [vmem:[%s7815_s4 + $0x190] sm:$0xff] }
  0x35   :  { %3492 = vmatpush.bf16.msrb.mxu2 %v5729_v46  ;;  %512 = vmatpush.bf16.msrb.mxu1 %v4201_v48  ;;  %v1282_v46 = vld [vmem:[#allocation1 + $0x9] sm:$0xff] }
  0x36   :  { %v566_v48 = vld [vmem:[%s7812_s1 + $0x8] sm:$0xff] }
  0x39   :  { %3493 = vmatpush.bf16.msrb.mxu2 %v5728_v49  ;;  %v6636_v49 = vld [vmem:[#allocation1 + $0x36] sm:$0xff] }
  0x3d   :  { %3494 = vmatpush.bf16.msrb.mxu2 %v5727_v50  ;;  %4272 = vmatmul.msk.bf16.vlgmr.msra.gmra.mxu3 %vm218_vm2, %v6258_v33  ;;  %v6638_v50 = vld [vmem:[#allocation1 + $0x1b] sm:$0xff] }
  0x3e   :  { %3504 = vmatpush.bf16.msra.mxu3 %v5738_v52  ;;  %v6642_v52 = vld [vmem:[#allocation1 + $0x3f] sm:$0xff] }
  0x3f   :  { %4269 = vmatmul.msk.bf16.gmra.mxu1 %vm218_vm2, %v6266_v37 }
  0x40   :  { %4271 = vmatmul.msk.bf16.gmra.mxu2 %vm218_vm2, %v6266_v37  ;;  %4274 = vmatmul.msk.bf16.vlgmr.msra.gmra.mxu0 %vm218_vm2, %v6258_v33 }
  0x41   :  { %3495 = vmatpush.bf16.msrb.mxu2 %v5726_v51  ;;  %3517 = vmatpush.bf16.msra.mxu0 %v5746_v53  ;;  %v6640_v51 = vld [vmem:[#allocation1 + $0x2d] sm:$0xff] }
  0x42   :  { %3505 = vmatpush.bf16.msra.mxu3 %v5737_v55  ;;  %1290 = vst [vmem:[#allocation1] ss:$9 sm:$0xff] %v566_v48  ;;  %v5772_v53 = vld [vmem:[%s7815_s4 + $0x188] sm:$0xff]  ;;  %v5791_v55 = vld [vmem:[%s7815_s4 + $0x220] sm:$0xff] }
  0x45   :  { %3496 = vmatpush.bf16.msrb.mxu2 %v5725_v54  ;;  %3518 = vmatpush.bf16.msra.mxu0 %v5745_v56  ;;  %v5763_v54 = vld [vmem:[%s7815_s4 + $0x140] sm:$0xff] }
  0x46   :  { %3506 = vmatpush.bf16.msra.mxu3 %v5736_v58  ;;  %v5783_v56 = vld [vmem:[%s7815_s4 + $0x1e0] sm:$0xff] }
  0x47   :  { %v5771_v58 = vld [vmem:[%s7815_s4 + $0x180] sm:$0xff] }
  0x49   :  { %3497 = vmatpush.bf16.msrb.mxu2 %v5724_v57  ;;  %3519 = vmatpush.bf16.msra.mxu0 %v5744_v59  ;;  %v5802_v57 = vld [vmem:[%s7815_s4 + $0x278] sm:$0xff] }
  0x4a   :  { %3507 = vmatpush.bf16.msra.mxu3 %v5735_v62  ;;  %v5790_v59 = vld [vmem:[%s7815_s4 + $0x218] sm:$0xff]  ;;  %v5801_v62 = vld [vmem:[%s7815_s4 + $0x270] sm:$0xff] }
  0x4d   :  { %3498 = vmatpush.bf16.msrb.mxu2 %v5723_v61  ;;  %3520 = vmatpush.bf16.msra.mxu0 %v5743_v63  ;;  %v5810_v61 = vld [vmem:[%s7815_s4 + $0x2b8] sm:$0xff]  ;;  %v5789_v63 = vld [vmem:[%s7815_s4 + $0x210] sm:$0xff] }
  0x4e   :  { %4273 = vmatmul.msk.bf16.gmra.mxu3 %vm218_vm2, %v6266_v37 }
  0x4f   :  { %4276 = vmatmul.msk.bf16.vlgmr.msra.gmra.mxu1 %vm218_vm2, %v6258_v33  ;;  %3508 = vmatpush.bf16.msra.mxu3 %v5734_v1  ;;  %v5800_v1 = vld [vmem:[%s7815_s4 + $0x268] sm:$0xff] }
  0x50   :  { %4278 = vmatmul.msk.bf16.vlgmr.msra.gmra.mxu2 %vm218_vm2, %v6258_v33  ;;  %4275 = vmatmul.msk.bf16.gmra.mxu0 %vm218_vm2, %v6266_v37 }
  0x51   :  { %3543 = vmatpush.bf16.msra.mxu2 %v5762_v0  ;;  %3530 = vmatpush.bf16.msra.mxu1 %v5754_v2  ;;  %v5809_v0 = vld [vmem:[%s7815_s4 + $0x2b0] sm:$0xff]  ;;  %v5788_v2 = vld [vmem:[%s7815_s4 + $0x208] sm:$0xff] }
  0x52   :  { %3521 = vmatpush.bf16.msra.mxu0 %v5742_v3  ;;  %v5780_v3 = vld [vmem:[%s7815_s4 + $0x1c8] sm:$0xff] }
  0x53   :  { %3509 = vmatpush.bf16.msra.mxu3 %v5733_v5  ;;  %v5799_v5 = vld [vmem:[%s7815_s4 + $0x260] sm:$0xff] }
  0x55   :  { %3544 = vmatpush.bf16.msra.mxu2 %v5761_v4  ;;  %3531 = vmatpush.bf16.msra.mxu1 %v5753_v6  ;;  %v5808_v4 = vld [vmem:[%s7815_s4 + $0x2a8] sm:$0xff] }
  0x56   :  { %3522 = vmatpush.bf16.msra.mxu0 %v5741_v7  ;;  %v5787_v7 = vld [vmem:[%s7815_s4 + $0x200] sm:$0xff] }
  0x57   :  { %3510 = vmatpush.bf16.msra.mxu3 %v5732_v9  ;;  %v5826_v9 = vld [vmem:[%s7815_s4 + $0x338] sm:$0xff] }
  0x59   :  { %3545 = vmatpush.bf16.msra.mxu2 %v5760_v8  ;;  %3532 = vmatpush.bf16.msra.mxu1 %v5752_v11  ;;  %v5779_v8 = vld [vmem:[%s7815_s4 + $0x1c0] sm:$0xff] }
  0x5a   :  { %3523 = vmatpush.bf16.msra.mxu0 %v5740_v12  ;;  %v5798_v12 = vld [vmem:[%s7815_s4 + $0x258] sm:$0xff] }
  0x5b   :  { %3511 = vmatpush.bf16.msra.mxu3 %v5731_v14 }
  0x5d   :  { %3546 = vmatpush.bf16.msra.mxu2 %v5759_v13  ;;  %3533 = vmatpush.bf16.msra.mxu1 %v5751_v15  ;;  %v5818_v13 = vld [vmem:[%s7815_s4 + $0x2f8] sm:$0xff]  ;;  %v5807_v15 = vld [vmem:[%s7815_s4 + $0x2a0] sm:$0xff] }
  0x5e   :  { %3524 = vmatpush.bf16.msra.mxu0 %v5739_v16  ;;  %4280 = vmatmul.msk.bf16.vlgmr.msrb.gmra.mxu3 %vm218_vm2, %v6258_v33 }
  0x5f   :  { %4277 = vmatmul.msk.bf16.gmra.mxu1 %vm218_vm2, %v6266_v37  ;;  %3556 = vmatpush.bf16.msrb.mxu3 %v5770_v17  ;;  %v5825_v17 = vld [vmem:[%s7815_s4 + $0x330] sm:$0xff] }
  0x60   :  { %4279 = vmatmul.msk.bf16.gmra.mxu2 %vm218_vm2, %v6266_v37  ;;  %4282 = vmatmul.msk.bf16.vlgmr.msrb.gmra.mxu0 %vm218_vm2, %v6258_v33 }
  0x61   :  { %3547 = vmatpush.bf16.msra.mxu2 %v5758_v18  ;;  %3534 = vmatpush.bf16.msra.mxu1 %v5750_v19  ;;  %v5797_v19 = vld [vmem:[%s7815_s4 + $0x250] sm:$0xff] }
  0x62   :  { %3569 = vmatpush.bf16.msrb.mxu0 %v5778_v20  ;;  %v5817_v20 = vld [vmem:[%s7815_s4 + $0x2f0] sm:$0xff] }
  0x63   :  { %3557 = vmatpush.bf16.msrb.mxu3 %v5769_v21 }
  0x65   :  { %3548 = vmatpush.bf16.msra.mxu2 %v5757_v22  ;;  %3535 = vmatpush.bf16.msra.mxu1 %v5749_v23  ;;  %v1291_v22 = vld [vmem:[#allocation1] sm:$0xff]  ;;  %v5806_v23 = vld [vmem:[%s7815_s4 + $0x298] sm:$0xff] }
  0x66   :  { %3570 = vmatpush.bf16.msrb.mxu0 %v5777_v24 }
  0x67   :  { %3558 = vmatpush.bf16.msrb.mxu3 %v5768_v25 }
  0x69   :  { %3549 = vmatpush.bf16.msra.mxu2 %v5756_v26  ;;  %3536 = vmatpush.bf16.msra.mxu1 %v5748_v27  ;;  %v5824_v26 = vld [vmem:[%s7815_s4 + $0x328] sm:$0xff] }
  0x6a   :  { %3571 = vmatpush.bf16.msrb.mxu0 %v5776_v28 }
  0x6b   :  { %3559 = vmatpush.bf16.msrb.mxu3 %v5767_v29 }
  0x6d   :  { %3550 = vmatpush.bf16.msra.mxu2 %v5755_v30  ;;  %3537 = vmatpush.bf16.msra.mxu1 %v5747_v31  ;;  %v5796_v30 = vld [vmem:[%s7815_s4 + $0x248] sm:$0xff] }
  0x6e   :  { %3572 = vmatpush.bf16.msrb.mxu0 %v5775_v32  ;;  %4281 = vmatmul.msk.bf16.gmra.mxu3 %vm218_vm2, %v6266_v37  ;;  %v5816_v31 = vld [vmem:[%s7815_s4 + $0x2e8] sm:$0xff] }
  0x6f   :  { %4284 = vmatmul.msk.bf16.vlgmr.msrb.gmra.mxu1 %vm218_vm2, %v6258_v33  ;;  %3560 = vmatpush.bf16.msrb.mxu3 %v5766_v34  ;;  %v5785_v33 = vld [vmem:[%s7815_s4 + $0x1f0] sm:$0xff] }
  0x70   :  { %3499 = vmatmul.bf16.vlgmr.msrb.gmra.mxu2 %v1281_v35  ;;  %4283 = vmatmul.msk.bf16.gmra.mxu0 %vm218_vm2, %v6266_v37  ;;  %v5805_v35 = vld [vmem:[%s7815_s4 + $0x290] sm:$0xff] }
  0x71   :  { %3595 = vmatpush.bf16.msrb.mxu2 %v5794_v36  ;;  %3582 = vmatpush.bf16.msrb.mxu1 %v5786_v38  ;;  %v5823_v38 = vld [vmem:[%s7815_s4 + $0x320] sm:$0xff] }
  0x72   :  { %3573 = vmatpush.bf16.msrb.mxu0 %v5774_v39 }
  0x73   :  { %3561 = vmatpush.bf16.msrb.mxu3 %v5765_v40  ;;  %v5795_v40 = vld [vmem:[%s7815_s4 + $0x240] sm:$0xff] }
  0x75   :  { %3596 = vmatpush.bf16.msrb.mxu2 %v5793_v41  ;;  %3583 = vmatpush.bf16.msrb.mxu1 %v5785_v33  ;;  %v6700_v6 = vpop.permute.xlu0 %71  ;;  %v5815_v41 = vld [vmem:[%s7815_s4 + $0x2e0] sm:$0xff]  ;;  %v5834_v33 = vld [vmem:[%s7815_s4 + $0x378] sm:$0xff] }
  0x76   :  { %3574 = vmatpush.bf16.msrb.mxu0 %v5773_v45 }
  0x77   :  { %3562 = vmatpush.bf16.msrb.mxu3 %v5764_v42  ;;  %v5804_v42 = vld [vmem:[%s7815_s4 + $0x288] sm:$0xff] }
  0x79   :  { %3597 = vmatpush.bf16.msrb.mxu2 %v5792_v43  ;;  %3584 = vmatpush.bf16.msrb.mxu1 %v5784_v44  ;;  %v5822_v44 = vld [vmem:[%s7815_s4 + $0x318] sm:$0xff] }
  0x7a   :  { %3575 = vmatpush.bf16.msrb.mxu0 %v5772_v53 }
  0x7b   :  { %3563 = vmatpush.bf16.msrb.mxu3 %v5763_v54  ;;  %v5821_v54 = vld [vmem:[%s7815_s4 + $0x310] sm:$0xff] }
  0x7d   :  { %3598 = vmatpush.bf16.msrb.mxu2 %v5791_v55  ;;  %3585 = vmatpush.bf16.msrb.mxu1 %v5783_v56  ;;  %v5842_v56 = vld [vmem:[%s7815_s4 + $0x3b8] sm:$0xff] }
  0x7e   :  { %3512 = vmatmul.bf16.vlgmr.msra.gmra.mxu3 %v1282_v46  ;;  %3576 = vmatpush.bf16.msrb.mxu0 %v5771_v58  ;;  %v5813_v58 = vld [vmem:[%s7815_s4 + $0x2d0] sm:$0xff] }
  0x7f   :  { %4285 = vmatmul.msk.bf16.gmra.mxu1 %vm218_vm2, %v6266_v37  ;;  %3608 = vmatpush.bf16.msra.mxu3 %v5802_v57  ;;  %v5781_v37 = vld [vmem:[%s7815_s4 + $0x1d0] sm:$0xff]  ;;  %v6814_v57 = vld [vmem:[#allocation1 + $0x3f] sm:$0xff] }
  0x80   :  { %3525 = vmatmul.bf16.vlgmr.msra.gmra.mxu0 %v1283_v47  ;;  %3551 = vmatmul.bf16.vlgmr.msra.gmra.mxu2 %v1285_v10  ;;  %v1292_v47 = vld [vmem:[#allocation1 + $0x9] sm:$0xff]  ;;  %v5814_v10 = vld [vmem:[%s7815_s4 + $0x2d8] sm:$0xff] }
  0x81   :  { %3599 = vmatpush.bf16.msrb.mxu2 %v5790_v59  ;;  %3586 = vmatpush.bf16.msrb.mxu1 %v5782_v60  ;;  %v5820_v59 = vld [vmem:[%s7815_s4 + $0x308] sm:$0xff] }
  0x82   :  { %3621 = vmatpush.bf16.msra.mxu0 %v5810_v61  ;;  %v5832_v60 = vld [vmem:[%s7815_s4 + $0x368] sm:$0xff]  ;;  %v1293_v61 = vld [vmem:[#allocation1 + $0x12] sm:$0xff] }
  0x83   :  { %3609 = vmatpush.bf16.msra.mxu3 %v5801_v62  ;;  %v6739_v21 = vpop.permute.xlu1 %81  ;;  %v1295_v62 = vld [vmem:[#allocation1 + $0x24] sm:$0xff] }
  0x84   :  { %v6744_v25 = vpop.permute.xlu0 %76 }
  0x85   :  { %3600 = vmatpush.bf16.msrb.mxu2 %v5789_v63  ;;  %3587 = vmatpush.bf16.msrb.mxu1 %v5781_v37  ;;  %v6835_v63 = vld [vmem:[#allocation1 + $0x36] sm:$0xff] }
  0x86   :  { %3622 = vmatpush.bf16.msra.mxu0 %v5809_v0  ;;  %v1294_v0 = vld [vmem:[#allocation1 + $0x1b] sm:$0xff] }
  0x87   :  { %3610 = vmatpush.bf16.msra.mxu3 %v5800_v1  ;;  %v6837_v1 = vld [vmem:[#allocation1 + $0x2d] sm:$0xff] }
  0x89   :  { %3601 = vmatpush.bf16.msrb.mxu2 %v5788_v2  ;;  %3588 = vmatpush.bf16.msrb.mxu1 %v5780_v3  ;;  %v567_v2 = vld [vmem:[%s7812_s1 + $0x10] sm:$0xff] }
  0x8a   :  { %3623 = vmatpush.bf16.msra.mxu0 %v5808_v4  ;;  %1300 = vst [vmem:[#allocation1] ss:$9 sm:$0xff] %v567_v2  ;;  %v5873_v2 = vld [vmem:[%s7815_s4 + $0x4b0] sm:$0xff] }
  0x8b   :  { %3611 = vmatpush.bf16.msra.mxu3 %v5799_v5 }
  0x8c   :  { %v298_v11 = vpop.f32.mrf.mxu1 }
  0x8d   :  { %3602 = vmatpush.bf16.msrb.mxu2 %v5787_v7  ;;  %v299_v14 = vadd.f32 %v298_v11, %v6700_v6  ;;  %3589 = vmatpush.bf16.msrb.mxu1 %v5779_v8  ;;  %v280_v16 = vpop.f32.mrf.mxu0  ;;  %v5812_v7 = vld [vmem:[%s7815_s4 + $0x2c8] sm:$0xff] }
  0x8e   :  { %v281_v18 = vadd.f32 %v280_v16, %v6700_v6  ;;  %3564 = vmatmul.bf16.vlgmr.msrb.gmra.mxu3 %v6640_v51  ;;  %3624 = vmatpush.bf16.msra.mxu0 %v5807_v15  ;;  %v5803_v51 = vld [vmem:[%s7815_s4 + $0x280] sm:$0xff]  ;;  %v5858_v15 = vld [vmem:[%s7815_s4 + $0x438] sm:$0xff] }
  0x8f   :  { %524 = vst [vmem:[%s7819_s8 + $0x8] sm:$0xff] %v299_v14  ;;  %3538 = vmatmul.bf16.vlgmr.msra.gmra.mxu1 %v6638_v50  ;;  %3612 = vmatpush.bf16.msra.mxu3 %v5798_v12  ;;  %v5833_v50 = vld [vmem:[%s7815_s4 + $0x370] sm:$0xff]  ;;  %v5819_v12 = vld [vmem:[%s7815_s4 + $0x300] sm:$0xff]  ;;  %v5840_v14 = vld [vmem:[%s7815_s4 + $0x3a8] sm:$0xff] }
  0x90   :  { %523 = vst [vmem:[%s7819_s8] sm:$0xff] %v281_v18  ;;  %v285_v24 = vpop.f32.mrf.mxu3  ;;  %3577 = vmatmul.bf16.vlgmr.msrb.gmra.mxu0 %v6636_v49  ;;  %3603 = vmatmul.bf16.vlgmr.msrb.gmra.mxu2 %v1291_v22  ;;  %v5811_v16 = vld [vmem:[%s7815_s4 + $0x2c0] sm:$0xff] }
  0x91   :  { %3647 = vmatpush.bf16.msra.mxu2 %v5826_v9  ;;  %3634 = vmatpush.bf16.msra.mxu1 %v5818_v13  ;;  %v286_v27 = vadd.f32 %v285_v24, %v6739_v21  ;;  %v5831_v9 = vld [vmem:[%s7815_s4 + $0x360] sm:$0xff] }
  0x92   :  { %3625 = vmatpush.bf16.msra.mxu0 %v5806_v23  ;;  %v5857_v23 = vld [vmem:[%s7815_s4 + $0x430] sm:$0xff] }
  0x93   :  { %v316_v28 = vpop.f32.mrf.mxu2  ;;  %3613 = vmatpush.bf16.msra.mxu3 %v5797_v19  ;;  %551 = vst [vmem:[%s7819_s8 + $0xe0] sm:$0xf] %v286_v27  ;;  %v5850_v19 = vld [vmem:[%s7815_s4 + $0x3f8] sm:$0xff] }
  0x94   :  { %v300_v29 = vpop.f32.mrf.mxu1  ;;  %v317_v32 = vadd.f32 %v316_v28, %v6700_v6  ;;  %v5829_v28 = vld [vmem:[%s7815_s4 + $0x350] sm:$0xff] }
  0x95   :  { %3648 = vmatpush.bf16.msra.mxu2 %v5825_v17  ;;  %3635 = vmatpush.bf16.msra.mxu1 %v5817_v20  ;;  %v301_v34 = vadd.f32 %v300_v29, %v6744_v25  ;;  %v282_v36 = vpop.f32.mrf.mxu0  ;;  %v5830_v17 = vld [vmem:[%s7815_s4 + $0x358] sm:$0xff]  ;;  %v5839_v20 = vld [vmem:[%s7815_s4 + $0x3a0] sm:$0xff] }
  0x96   :  { %v283_v39 = vadd.f32 %v282_v36, %v6744_v25  ;;  %525 = vst [vmem:[%s7819_s8 + $0x10] sm:$0xff] %v317_v32  ;;  %3626 = vmatpush.bf16.msra.mxu0 %v5805_v35  ;;  %v5838_v32 = vld [vmem:[%s7815_s4 + $0x398] sm:$0xff]  ;;  %v5828_v35 = vld [vmem:[%s7815_s4 + $0x348] sm:$0xff] }
  0x97   :  { %538 = vst [vmem:[%s7819_s8 + $0x78] sm:$0xff] %v301_v34  ;;  %3614 = vmatpush.bf16.msra.mxu3 %v5796_v30  ;;  %v5849_v30 = vld [vmem:[%s7815_s4 + $0x3f0] sm:$0xff]  ;;  %v5856_v34 = vld [vmem:[%s7815_s4 + $0x428] sm:$0xff] }
  0x98   :  { %537 = vst [vmem:[%s7819_s8 + $0x70] sm:$0xff] %v283_v39  ;;  %v287_v43 = vpop.f32.mrf.mxu3  ;;  %v5837_v39 = vld [vmem:[%s7815_s4 + $0x390] sm:$0xff] }
  0x99   :  { %3649 = vmatpush.bf16.msra.mxu2 %v5824_v26  ;;  %3636 = vmatpush.bf16.msra.mxu1 %v5816_v31 }
  0x9a   :  { %3627 = vmatpush.bf16.msra.mxu0 %v5804_v42 }
  0x9b   :  { %v318_v45 = vpop.f32.mrf.mxu2  ;;  %3615 = vmatpush.bf16.msra.mxu3 %v5795_v40 }
  0x9c   :  { %v303_v46 = vpop.f32.mrf.mxu1  ;;  %v319_v48 = vadd.f32 %v318_v45, %v6744_v25  ;;  %v5827_v45 = vld [vmem:[%s7815_s4 + $0x340] sm:$0xff] }
  0x9d   :  { %3650 = vmatpush.bf16.msra.mxu2 %v5823_v38  ;;  %3637 = vmatpush.bf16.msra.mxu1 %v5815_v41  ;;  %v304_v49 = vadd.f32 %v303_v46, %v6739_v21  ;;  %v352_v53 = vpop.f32.mrf.mxu0  ;;  %v5848_v38 = vld [vmem:[%s7815_s4 + $0x3e8] sm:$0xff]  ;;  %v5855_v41 = vld [vmem:[%s7815_s4 + $0x420] sm:$0xff] }
  0x9e   :  { %v353_v55 = vadd.f32 %v352_v53, %v6700_v6  ;;  %539 = vst [vmem:[%s7819_s8 + $0x80] sm:$0xff] %v319_v48  ;;  %3616 = vmatmul.bf16.vlgmr.msra.gmra.mxu3 %v1292_v47  ;;  %3628 = vmatpush.bf16.msra.mxu0 %v5803_v51  ;;  %v5847_v47 = vld [vmem:[%s7815_s4 + $0x3e0] sm:$0xff]  ;;  %v5854_v48 = vld [vmem:[%s7815_s4 + $0x418] sm:$0xff]  ;;  %v5865_v53 = vld [vmem:[%s7815_s4 + $0x470] sm:$0xff] }
  0x9f   :  { %3660 = vmatpush.bf16.msrb.mxu3 %v5834_v33  ;;  %552 = vst [vmem:[%s7819_s8 + $0xe8] sm:$0xf] %v304_v49  ;;  %3590 = vmatmul.bf16.vlgmr.msrb.gmra.mxu1 %v6642_v52  ;;  %v5841_v52 = vld [vmem:[%s7815_s4 + $0x3b0] sm:$0xff]  ;;  %v5836_v49 = vld [vmem:[%s7815_s4 + $0x388] sm:$0xff]  ;;  %v5846_v51 = vld [vmem:[%s7815_s4 + $0x3d8] sm:$0xff] }
  0xa0   :  { %527 = vst [vmem:[%s7819_s8 + $0x20] sm:$0xff] %v353_v55  ;;  %v334_v37 = vpop.f32.mrf.mxu3  ;;  %v5835_v55 = vld [vmem:[%s7815_s4 + $0x380] sm:$0xff] }
  0xa1   :  { %3651 = vmatpush.bf16.msra.mxu2 %v5822_v44  ;;  %3638 = vmatpush.bf16.msra.mxu1 %v5814_v10  ;;  %v335_v3 = vadd.f32 %v334_v37, %v6700_v6  ;;  %v5866_v10 = vld [vmem:[%s7815_s4 + $0x478] sm:$0xff]  ;;  %v5864_v37 = vld [vmem:[%s7815_s4 + $0x468] sm:$0xff] }
  0xa2   :  { %3673 = vmatpush.bf16.msrb.mxu0 %v5842_v56 }
  0xa3   :  { %3661 = vmatpush.bf16.msrb.mxu3 %v5833_v50  ;;  %v321_v4 = vpop.f32.mrf.mxu2  ;;  %3629 = vmatmul.bf16.vlgmr.msra.gmra.mxu0 %v1293_v61  ;;  %526 = vst [vmem:[%s7819_s8 + $0x18] sm:$0xff] %v335_v3 }
  0xa4   :  { %v305_v5 = vpop.f32.mrf.mxu1  ;;  %v322_v8 = vadd.f32 %v321_v4, %v6739_v21  ;;  %v5844_v4 = vld [vmem:[%s7815_s4 + $0x3c8] sm:$0xff] }
  0xa5   :  { %3652 = vmatpush.bf16.msra.mxu2 %v5821_v54  ;;  %3639 = vmatpush.bf16.msra.mxu1 %v5813_v58  ;;  %v354_v11 = vpop.f32.mrf.mxu0  ;;  %v5853_v54 = vld [vmem:[%s7815_s4 + $0x410] sm:$0xff]  ;;  %v5863_v5 = vld [vmem:[%s7815_s4 + $0x460] sm:$0xff] }
  0xa6   :  { %3674 = vmatpush.bf16.msrb.mxu0 %v5841_v52  ;;  %v355_v13 = vadd.f32 %v354_v11, %v6744_v25  ;;  %553 = vst [vmem:[%s7819_s8 + $0xf0] sm:$0xf] %v322_v8  ;;  %v5851_v8 = vld [vmem:[%s7815_s4 + $0x400] sm:$0xff] }
  0xa7   :  { %3662 = vmatpush.bf16.msrb.mxu3 %v5832_v60 }
  0xa8   :  { %541 = vst [vmem:[%s7819_s8 + $0x90] sm:$0xff] %v355_v13  ;;  %v336_v18 = vpop.f32.mrf.mxu3  ;;  %v5872_v13 = vld [vmem:[%s7815_s4 + $0x4a8] sm:$0xff] }
  0xa9   :  { %3653 = vmatpush.bf16.msra.mxu2 %v5820_v59  ;;  %3640 = vmatpush.bf16.msra.mxu1 %v5812_v7  ;;  %v337_v22 = vadd.f32 %v336_v18, %v6744_v25  ;;  %v5874_v59 = vld [vmem:[%s7815_s4 + $0x4b8] sm:$0xff] }
  0xaa   :  { %3675 = vmatpush.bf16.msrb.mxu0 %v5840_v14  ;;  %v5862_v18 = vld [vmem:[%s7815_s4 + $0x458] sm:$0xff] }
  0xab   :  { %3663 = vmatpush.bf16.msrb.mxu3 %v5831_v9  ;;  %v323_v24 = vpop.f32.mrf.mxu2  ;;  %540 = vst [vmem:[%s7819_s8 + $0x88] sm:$0xff] %v337_v22  ;;  %v5871_v22 = vld [vmem:[%s7815_s4 + $0x4a0] sm:$0xff] }
  0xac   :  { %v370_v26 = vpop.f32.mrf.mxu1 }
  0xad   :  { %3654 = vmatpush.bf16.msra.mxu2 %v5819_v12  ;;  %3641 = vmatpush.bf16.msra.mxu1 %v5811_v16  ;;  %v371_v27 = vadd.f32 %v370_v26, %v6700_v6  ;;  %v357_v29 = vpop.f32.mrf.mxu0  ;;  %v5890_v12 = vld [vmem:[%s7815_s4 + $0x538] sm:$0xff]  ;;  %v5861_v26 = vld [vmem:[%s7815_s4 + $0x450] sm:$0xff] }
  0xae   :  { %3676 = vmatpush.bf16.msrb.mxu0 %v5839_v20  ;;  %v358_v31 = vadd.f32 %v357_v29, %v6739_v21  ;;  %v5889_v20 = vld [vmem:[%s7815_s4 + $0x530] sm:$0xff] }
  0xaf   :  { %3664 = vmatpush.bf16.msrb.mxu3 %v5830_v17  ;;  %528 = vst [vmem:[%s7819_s8 + $0x28] sm:$0xff] %v371_v27  ;;  %v1301_v17 = vld [vmem:[#allocation1] sm:$0xff]  ;;  %v5881_v27 = vld [vmem:[%s7815_s4 + $0x4f0] sm:$0xff] }
  0xb0   :  { %3655 = vmatmul.bf16.vlgmr.msra.gmra.mxu2 %v1295_v62  ;;  %3642 = vmatmul.bf16.vlgmr.msra.gmra.mxu1 %v1294_v0  ;;  %555 = vst [vmem:[%s7819_s8 + $0x100] sm:$0xf] %v358_v31  ;;  %v339_v36 = vpop.f32.mrf.mxu3  ;;  %v5845_v62 = vld [vmem:[%s7815_s4 + $0x3d0] sm:$0xff]  ;;  %v5870_v31 = vld [vmem:[%s7815_s4 + $0x498] sm:$0xff] }
  0xb1   :  { %3699 = vmatpush.bf16.msrb.mxu2 %v5858_v15  ;;  %3686 = vmatpush.bf16.msrb.mxu1 %v5850_v19  ;;  %v340_v40 = vadd.f32 %v339_v36, %v6739_v21  ;;  %v5843_v15 = vld [vmem:[%s7815_s4 + $0x3c0] sm:$0xff]  ;;  %v5882_v19 = vld [vmem:[%s7815_s4 + $0x4f8] sm:$0xff]  ;;  %v5860_v36 = vld [vmem:[%s7815_s4 + $0x448] sm:$0xff] }
  0xb2   :  { %3677 = vmatpush.bf16.msrb.mxu0 %v5838_v32 }
  0xb3   :  { %3665 = vmatpush.bf16.msrb.mxu3 %v5829_v28  ;;  %v388_v33 = vpop.f32.mrf.mxu2  ;;  %554 = vst [vmem:[%s7819_s8 + $0xf8] sm:$0xf] %v340_v40 }
  0xb4   :  { %v372_v42 = vpop.f32.mrf.mxu1  ;;  %v389_v43 = vadd.f32 %v388_v33, %v6700_v6  ;;  %v5859_v33 = vld [vmem:[%s7815_s4 + $0x440] sm:$0xff] }
  0xb5   :  { %3700 = vmatpush.bf16.msrb.mxu2 %v5857_v23  ;;  %3687 = vmatpush.bf16.msrb.mxu1 %v5849_v30  ;;  %v373_v44 = vadd.f32 %v372_v42, %v6744_v25  ;;  %v359_v46 = vpop.f32.mrf.mxu0  ;;  %v5888_v30 = vld [vmem:[%s7815_s4 + $0x528] sm:$0xff]  ;;  %v5879_v42 = vld [vmem:[%s7815_s4 + $0x4e0] sm:$0xff] }
  0xb6   :  { %3678 = vmatpush.bf16.msrb.mxu0 %v5837_v39  ;;  %529 = vst [vmem:[%s7819_s8 + $0x30] sm:$0xff] %v389_v43  ;;  %v5869_v39 = vld [vmem:[%s7815_s4 + $0x490] sm:$0xff]  ;;  %v5898_v46 = vld [vmem:[%s7815_s4 + $0x578] sm:$0xff] }
  0xb7   :  { %3666 = vmatpush.bf16.msrb.mxu3 %v5828_v35  ;;  %542 = vst [vmem:[%s7819_s8 + $0x98] sm:$0xff] %v373_v44 }
  0xb8   :  { %v341_v50 = vpop.f32.mrf.mxu3 }
  0xb9   :  { %3701 = vmatpush.bf16.msrb.mxu2 %v5856_v34  ;;  %3688 = vmatpush.bf16.msrb.mxu1 %v5848_v38  ;;  %v5880_v38 = vld [vmem:[%s7815_s4 + $0x4e8] sm:$0xff] }
  0xba   :  { %3679 = vmatpush.bf16.msrb.mxu0 %v5836_v49  ;;  %v1302_v50 = vld [vmem:[#allocation1 + $0x9] sm:$0xff] }
  0xbb   :  { %3667 = vmatpush.bf16.msrb.mxu3 %v5827_v45  ;;  %v390_v56 = vpop.f32.mrf.mxu2  ;;  %v5886_v45 = vld [vmem:[%s7815_s4 + $0x518] sm:$0xff] }
  0xbc   :  { %v375_v58 = vpop.f32.mrf.mxu1  ;;  %v391_v60 = vadd.f32 %v390_v56, %v6744_v25  ;;  %v5867_v56 = vld [vmem:[%s7815_s4 + $0x480] sm:$0xff] }
  0xbd   :  { %3702 = vmatpush.bf16.msrb.mxu2 %v5855_v41  ;;  %3689 = vmatpush.bf16.msrb.mxu1 %v5847_v47  ;;  %v376_v52 = vadd.f32 %v375_v58, %v6739_v21  ;;  %v424_v61 = vpop.f32.mrf.mxu0  ;;  %v5906_v58 = vld [vmem:[%s7815_s4 + $0x5b8] sm:$0xff] }
  0xbe   :  { %3668 = vmatmul.bf16.vlgmr.msrb.gmra.mxu3 %v6837_v1  ;;  %v425_v0 = vadd.f32 %v424_v61, %v6700_v6  ;;  %543 = vst [vmem:[%s7819_s8 + $0xa0] sm:$0xff] %v391_v60  ;;  %3680 = vmatpush.bf16.msrb.mxu0 %v5835_v55  ;;  %v5852_v1 = vld [vmem:[%s7815_s4 + $0x408] sm:$0xff]  ;;  %v7103_v55 = vld [vmem:[#allocation1 + $0x3f] sm:$0xff]  ;;  %v5877_v60 = vld [vmem:[%s7815_s4 + $0x4d0] sm:$0xff] }
  0xbf   :  { %3712 = vmatpush.bf16.msra.mxu3 %v5866_v10  ;;  %556 = vst [vmem:[%s7819_s8 + $0x108] sm:$0xf] %v376_v52  ;;  %v5884_v52 = vld [vmem:[%s7815_s4 + $0x508] sm:$0xff] }
  0xc0   :  { %531 = vst [vmem:[%s7819_s8 + $0x40] sm:$0xff] %v425_v0  ;;  %v406_v3 = vpop.f32.mrf.mxu3  ;;  %v5896_v61 = vld [vmem:[%s7815_s4 + $0x568] sm:$0xff] }
  0xc1   :  { %3703 = vmatpush.bf16.msrb.mxu2 %v5854_v48  ;;  %3690 = vmatpush.bf16.msrb.mxu1 %v5846_v51  ;;  %v407_v7 = vadd.f32 %v406_v3, %v6700_v6  ;;  %v5868_v48 = vld [vmem:[%s7815_s4 + $0x488] sm:$0xff]  ;;  %v5878_v51 = vld [vmem:[%s7815_s4 + $0x4d8] sm:$0xff] }
  0xc2   :  { %3725 = vmatpush.bf16.msra.mxu0 %v5874_v59 }
  0xc3   :  { %3713 = vmatpush.bf16.msra.mxu3 %v5865_v53  ;;  %3681 = vmatmul.bf16.vlgmr.msrb.gmra.mxu0 %v6835_v63  ;;  %v393_v9 = vpop.f32.mrf.mxu2  ;;  %530 = vst [vmem:[%s7819_s8 + $0x38] sm:$0xff] %v407_v7  ;;  %v5885_v53 = vld [vmem:[%s7815_s4 + $0x510] sm:$0xff] }
  0xc4   :  { %v377_v11 = vpop.f32.mrf.mxu1  ;;  %v394_v14 = vadd.f32 %v393_v9, %v6739_v21  ;;  %v7126_v7 = vld [vmem:[#allocation1 + $0x36] sm:$0xff] }
  0xc5   :  { %3704 = vmatpush.bf16.msrb.mxu2 %v5853_v54  ;;  %3691 = vmatpush.bf16.msrb.mxu1 %v5845_v62  ;;  %v426_v63 = vpop.f32.mrf.mxu0  ;;  %v5897_v54 = vld [vmem:[%s7815_s4 + $0x570] sm:$0xff] }
  0xc6   :  { %3726 = vmatpush.bf16.msra.mxu0 %v5873_v2  ;;  %v427_v16 = vadd.f32 %v426_v63, %v6744_v25  ;;  %557 = vst [vmem:[%s7819_s8 + $0x110] sm:$0xf] %v394_v14  ;;  %v1303_v62 = vld [vmem:[#allocation1 + $0x12] sm:$0xff]  ;;  %v5883_v14 = vld [vmem:[%s7815_s4 + $0x500] sm:$0xff] }
  0xc7   :  { %3714 = vmatpush.bf16.msra.mxu3 %v5864_v37  ;;  %v1305_v37 = vld [vmem:[#allocation1 + $0x24] sm:$0xff]  ;;  %v5905_v9 = vld [vmem:[%s7815_s4 + $0x5b0] sm:$0xff] }
  0xc8   :  { %545 = vst [vmem:[%s7819_s8 + $0xb0] sm:$0xff] %v427_v16  ;;  %v408_v23 = vpop.f32.mrf.mxu3  ;;  %v5895_v63 = vld [vmem:[%s7815_s4 + $0x560] sm:$0xff] }
  0xc9   :  { %3705 = vmatpush.bf16.msrb.mxu2 %v5852_v1  ;;  %3692 = vmatpush.bf16.msrb.mxu1 %v5844_v4  ;;  %v409_v24 = vadd.f32 %v408_v23, %v6744_v25  ;;  %v568_v1 = vld [vmem:[%s7812_s1 + $0x18] sm:$0xff] }
  0xca   :  { %3727 = vmatpush.bf16.msra.mxu0 %v5872_v13  ;;  %v1304_v4 = vld [vmem:[#allocation1 + $0x1b] sm:$0xff] }
  0xcb   :  { %3715 = vmatpush.bf16.msra.mxu3 %v5863_v5  ;;  %v395_v28 = vpop.f32.mrf.mxu2  ;;  %544 = vst [vmem:[%s7819_s8 + $0xa8] sm:$0xff] %v409_v24  ;;  %v7124_v5 = vld [vmem:[#allocation1 + $0x2d] sm:$0xff]  ;;  %v5894_v23 = vld [vmem:[%s7815_s4 + $0x558] sm:$0xff] }
  0xcc   :  { %v442_v29 = vpop.f32.mrf.mxu1  ;;  %1310 = vst [vmem:[#allocation1] ss:$9 sm:$0xff] %v568_v1  ;;  %v5914_v24 = vld [vmem:[%s7815_s4 + $0x5f8] sm:$0xff]  ;;  %v5903_v28 = vld [vmem:[%s7815_s4 + $0x5a0] sm:$0xff]  ;;  %v5937_v1 = vld [vmem:[%s7815_s4 + $0x6b0] sm:$0xff] }
  0xcd   :  { %3706 = vmatpush.bf16.msrb.mxu2 %v5851_v8  ;;  %3693 = vmatpush.bf16.msrb.mxu1 %v5843_v15  ;;  %v443_v32 = vadd.f32 %v442_v29, %v6700_v6  ;;  %v429_v34 = vpop.f32.mrf.mxu0  ;;  %v5922_v15 = vld [vmem:[%s7815_s4 + $0x638] sm:$0xff] }
  0xce   :  { %3728 = vmatpush.bf16.msra.mxu0 %v5871_v22  ;;  %v430_v35 = vadd.f32 %v429_v34, %v6739_v21  ;;  %v5920_v34 = vld [vmem:[%s7815_s4 + $0x628] sm:$0xff] }
  0xcf   :  { %3716 = vmatpush.bf16.msra.mxu3 %v5862_v18  ;;  %532 = vst [vmem:[%s7819_s8 + $0x48] sm:$0xff] %v443_v32  ;;  %v5913_v32 = vld [vmem:[%s7815_s4 + $0x5f0] sm:$0xff] }
  0xd0   :  { %3707 = vmatmul.bf16.vlgmr.msrb.gmra.mxu2 %v1301_v17  ;;  %3694 = vmatmul.bf16.vlgmr.msrb.gmra.mxu1 %v6814_v57  ;;  %559 = vst [vmem:[%s7819_s8 + $0x120] sm:$0xf] %v430_v35  ;;  %v5887_v57 = vld [vmem:[%s7815_s4 + $0x520] sm:$0xff]  ;;  %v5904_v17 = vld [vmem:[%s7815_s4 + $0x5a8] sm:$0xff] }
  0xd1   :  { %3751 = vmatpush.bf16.msra.mxu2 %v5890_v12  ;;  %3738 = vmatpush.bf16.msra.mxu1 %v5882_v19  ;;  %v411_v40 = vpop.f32.mrf.mxu3  ;;  %v5876_v12 = vld [vmem:[%s7815_s4 + $0x4c8] sm:$0xff]  ;;  %v5875_v19 = vld [vmem:[%s7815_s4 + $0x4c0] sm:$0xff] }
  0xd2   :  { %3729 = vmatpush.bf16.msra.mxu0 %v5870_v31  ;;  %v412_v41 = vadd.f32 %v411_v40, %v6739_v21  ;;  %v5893_v31 = vld [vmem:[%s7815_s4 + $0x550] sm:$0xff]  ;;  %v5892_v40 = vld [vmem:[%s7815_s4 + $0x548] sm:$0xff] }
  0xd3   :  { %3717 = vmatpush.bf16.msra.mxu3 %v5861_v26  ;;  %v460_v43 = vpop.f32.mrf.mxu2 }
  0xd4   :  { %v444_v44 = vpop.f32.mrf.mxu1  ;;  %v461_v47 = vadd.f32 %v460_v43, %v6700_v6  ;;  %558 = vst [vmem:[%s7819_s8 + $0x118] sm:$0xf] %v412_v41  ;;  %v5912_v41 = vld [vmem:[%s7815_s4 + $0x5e8] sm:$0xff]  ;;  %v5901_v43 = vld [vmem:[%s7815_s4 + $0x590] sm:$0xff] }
  0xd5   :  { %3752 = vmatpush.bf16.msra.mxu2 %v5889_v20  ;;  %3739 = vmatpush.bf16.msra.mxu1 %v5881_v27  ;;  %v445_v10 = vadd.f32 %v444_v44, %v6744_v25  ;;  %v431_v49 = vpop.f32.mrf.mxu0  ;;  %v5921_v27 = vld [vmem:[%s7815_s4 + $0x630] sm:$0xff] }
  0xd6   :  { %3730 = vmatpush.bf16.msra.mxu0 %v5869_v39  ;;  %533 = vst [vmem:[%s7819_s8 + $0x50] sm:$0xff] %v461_v47  ;;  %v5918_v47 = vld [vmem:[%s7815_s4 + $0x618] sm:$0xff]  ;;  %v5900_v49 = vld [vmem:[%s7815_s4 + $0x588] sm:$0xff] }
  0xd7   :  { %3718 = vmatpush.bf16.msra.mxu3 %v5860_v36  ;;  %546 = vst [vmem:[%s7819_s8 + $0xb8] sm:$0xff] %v445_v10  ;;  %v5902_v36 = vld [vmem:[%s7815_s4 + $0x598] sm:$0xff] }
  0xd8   :  { %v5930_v10 = vld [vmem:[%s7815_s4 + $0x678] sm:$0xff] }
  0xd9   :  { %3753 = vmatpush.bf16.msra.mxu2 %v5888_v30  ;;  %3740 = vmatpush.bf16.msra.mxu1 %v5880_v38  ;;  %v413_v59 = vpop.f32.mrf.mxu3 }
  0xda   :  { %3731 = vmatpush.bf16.msra.mxu0 %v5868_v48  ;;  %v5929_v59 = vld [vmem:[%s7815_s4 + $0x670] sm:$0xff] }
  0xdb   :  { %3719 = vmatpush.bf16.msra.mxu3 %v5859_v33  ;;  %v462_v0 = vpop.f32.mrf.mxu2 }
  0xdc   :  { %v447_v2 = vpop.f32.mrf.mxu1  ;;  %v463_v3 = vadd.f32 %v462_v0, %v6744_v25 }
  0xdd   :  { %3754 = vmatpush.bf16.msra.mxu2 %v5887_v57  ;;  %3741 = vmatpush.bf16.msra.mxu1 %v5879_v42  ;;  %v448_v8 = vadd.f32 %v447_v2, %v6739_v21  ;;  %v496_v11 = vpop.f32.mrf.mxu0  ;;  %v5919_v42 = vld [vmem:[%s7815_s4 + $0x620] sm:$0xff] }
  0xde   :  { %3720 = vmatmul.bf16.vlgmr.msra.gmra.mxu3 %v1302_v50  ;;  %3732 = vmatpush.bf16.msra.mxu0 %v5867_v56  ;;  %547 = vst [vmem:[%s7819_s8 + $0xc0] sm:$0xff] %v463_v3  ;;  %v497_v13 = vadd.f32 %v496_v11, %v6700_v6  ;;  %v6083_v2 = vld [vmem:[%s7816_s5] ss:$0 sm:$0xff] }
  0xdf   :  { %3764 = vmatpush.bf16.msrb.mxu3 %v5898_v46  ;;  %560 = vst [vmem:[%s7819_s8 + $0x128] sm:$0xf] %v448_v8  ;;  %v5911_v46 = vld [vmem:[%s7815_s4 + $0x5e0] sm:$0xff] }
  0xe0   :  { %535 = vst [vmem:[%s7819_s8 + $0x60] sm:$0xff] %v497_v13  ;;  %v5927_v11 = vld [vmem:[%s7815_s4 + $0x660] sm:$0xff]  ;;  %v5936_v13 = vld [vmem:[%s7815_s4 + $0x6a8] sm:$0xff] }
  0xe1   :  { %3755 = vmatpush.bf16.msra.mxu2 %v5886_v45  ;;  %3742 = vmatpush.bf16.msra.mxu1 %v5878_v51  ;;  %v478_v16 = vpop.f32.mrf.mxu3 }
  0xe2   :  { %3777 = vmatpush.bf16.msrb.mxu0 %v5906_v58  ;;  %v479_v18 = vadd.f32 %v478_v16, %v6700_v6  ;;  %v5917_v58 = vld [vmem:[%s7815_s4 + $0x610] sm:$0xff]  ;;  %v5946_v16 = vld [vmem:[%s7815_s4 + $0x6f8] sm:$0xff] }
  0xe3   :  { %3765 = vmatpush.bf16.msrb.mxu3 %v5897_v54  ;;  %3733 = vmatmul.bf16.vlgmr.msra.gmra.mxu0 %v1303_v62  ;;  %v465_v20 = vpop.f32.mrf.mxu2  ;;  %v5910_v54 = vld [vmem:[%s7815_s4 + $0x5d8] sm:$0xff]  ;;  %v5916_v62 = vld [vmem:[%s7815_s4 + $0x608] sm:$0xff] }
  0xe4   :  { %v449_v22 = vpop.f32.mrf.mxu1  ;;  %v466_v26 = vadd.f32 %v465_v20, %v6739_v21  ;;  %534 = vst [vmem:[%s7819_s8 + $0x58] sm:$0xff] %v479_v18  ;;  %v5953_v18 = vld [vmem:[%s7815_s4 + $0x730] sm:$0xff]  ;;  %v5935_v20 = vld [vmem:[%s7815_s4 + $0x6a0] sm:$0xff] }
  0xe5   :  { %3756 = vmatpush.bf16.msra.mxu2 %v5885_v53  ;;  %3743 = vmatpush.bf16.msra.mxu1 %v5877_v60  ;;  %v498_v29 = vpop.f32.mrf.mxu0  ;;  %v5899_v60 = vld [vmem:[%s7815_s4 + $0x580] sm:$0xff] }
  0xe6   :  { %3778 = vmatpush.bf16.msrb.mxu0 %v5905_v9  ;;  %561 = vst [vmem:[%s7819_s8 + $0x130] sm:$0xf] %v466_v26  ;;  %v499_v30 = vadd.f32 %v498_v29, %v6744_v25  ;;  %v5915_v9 = vld [vmem:[%s7815_s4 + $0x600] sm:$0xff]  ;;  %v5945_v26 = vld [vmem:[%s7815_s4 + $0x6f0] sm:$0xff]  ;;  %v5934_v29 = vld [vmem:[%s7815_s4 + $0x698] sm:$0xff] }
  0xe7   :  { %3766 = vmatpush.bf16.msrb.mxu3 %v5896_v61  ;;  %v5909_v61 = vld [vmem:[%s7815_s4 + $0x5d0] sm:$0xff] }
  0xe8   :  { %549 = vst [vmem:[%s7819_s8 + $0xd0] sm:$0xff] %v499_v30 }
  0xe9   :  { %3757 = vmatpush.bf16.msra.mxu2 %v5884_v52  ;;  %3744 = vmatpush.bf16.msra.mxu1 %v5876_v12  ;;  %v480_v35 = vpop.f32.mrf.mxu3  ;;  %v5954_v12 = vld [vmem:[%s7815_s4 + $0x738] sm:$0xff] }
  0xea   :  { %3779 = vmatpush.bf16.msrb.mxu0 %v5904_v17  ;;  %v481_v38 = vadd.f32 %v480_v35, %v6744_v25  ;;  %v5933_v35 = vld [vmem:[%s7815_s4 + $0x690] sm:$0xff] }
  0xeb   :  { %3767 = vmatpush.bf16.msrb.mxu3 %v5895_v63  ;;  %v467_v57 = vpop.f32.mrf.mxu2  ;;  %v1311_v63 = vld [vmem:[#allocation1] sm:$0xff] }
  0xec   :  { %v514_v39 = vpop.f32.mrf.mxu1  ;;  %548 = vst [vmem:[%s7819_s8 + $0xc8] sm:$0xff] %v481_v38  ;;  %v5923_v57 = vld [vmem:[%s7815_s4 + $0x640] sm:$0xff] }
  0xed   :  { %3758 = vmatpush.bf16.msra.mxu2 %v5883_v14  ;;  %3745 = vmatpush.bf16.msra.mxu1 %v5875_v19  ;;  %v515_v33 = vadd.f32 %v514_v39, %v6700_v6  ;;  %v501_v44 = vpop.f32.mrf.mxu0  ;;  %v5891_v6 = vld [vmem:[%s7815_s4 + $0x540] sm:$0xff] }
  0xee   :  { %3780 = vmatpush.bf16.msrb.mxu0 %v5903_v28  ;;  %v502_v45 = vadd.f32 %v501_v44, %v6739_v21  ;;  %v5952_v28 = vld [vmem:[%s7815_s4 + $0x728] sm:$0xff]  ;;  %v5943_v39 = vld [vmem:[%s7815_s4 + $0x6e0] sm:$0xff] }
  0xef   :  { %3768 = vmatpush.bf16.msrb.mxu3 %v5894_v23  ;;  %536 = vst [vmem:[%s7819_s8 + $0x68] sm:$0xff] %v515_v33  ;;  %v5962_v33 = vld [vmem:[%s7815_s4 + $0x778] sm:$0xff] }
  0xf0   :  { %3759 = vmatmul.bf16.vlgmr.msra.gmra.mxu2 %v1305_v37  ;;  %3746 = vmatmul.bf16.vlgmr.msra.gmra.mxu1 %v1304_v4  ;;  %563 = vst [vmem:[%s7819_s8 + $0x140] sm:$0xf] %v502_v45  ;;  %v5928_v37 = vld [vmem:[%s7815_s4 + $0x668] sm:$0xff] }
  0xf1   :  { %3803 = vmatpush.bf16.msrb.mxu2 %v5922_v15  ;;  %3790 = vmatpush.bf16.msrb.mxu1 %v5914_v24  ;;  %v483_v48 = vpop.f32.mrf.mxu3  ;;  %v5926_v15 = vld [vmem:[%s7815_s4 + $0x658] sm:$0xff]  ;;  %v5925_v24 = vld [vmem:[%s7815_s4 + $0x650] sm:$0xff] }
  0xf2   :  { %3781 = vmatpush.bf16.msrb.mxu0 %v5902_v36  ;;  %v484_v50 = vadd.f32 %v483_v48, %v6739_v21  ;;  %v1312_v45 = vld [vmem:[#allocation1 + $0x9] sm:$0xff]  ;;  %v7358_v48 = vld [vmem:[#allocation1 + $0x3f] sm:$0xff] }
  0xf3   :  { %3769 = vmatpush.bf16.msrb.mxu3 %v5893_v31  ;;  %v3500_v51 = vpop.f32.mrf.mxu2  ;;  %v5924_v31 = vld [vmem:[%s7815_s4 + $0x648] sm:$0xff] }
  0xf4   :  { %v516_v53 = vpop.f32.mrf.mxu1  ;;  %562 = vst [vmem:[%s7819_s8 + $0x138] sm:$0xf] %v484_v50  ;;  %v5931_v50 = vld [vmem:[%s7815_s4 + $0x680] sm:$0xff] }
  0xf5   :  { %3804 = vmatpush.bf16.msrb.mxu2 %v5921_v27  ;;  %3791 = vmatpush.bf16.msrb.mxu1 %v5913_v32  ;;  %v517_v56 = vadd.f32 %v516_v53, %v6744_v25  ;;  %v5938_v25 = vld [vmem:[%s7815_s4 + $0x6b8] sm:$0xff]  ;;  %v503_v52 = vpop.f32.mrf.mxu0  ;;  %v5944_v32 = vld [vmem:[%s7815_s4 + $0x6e8] sm:$0xff] }
  0xf6   :  { %3782 = vmatpush.bf16.msrb.mxu0 %v5901_v43  ;;  %v5932_v43 = vld [vmem:[%s7815_s4 + $0x688] sm:$0xff]  ;;  %v569_v52 = vld [vmem:[%s7812_s1 + $0x20] sm:$0xff] }
  0xf7   :  { %3770 = vmatpush.bf16.msrb.mxu3 %v5892_v40  ;;  %550 = vst [vmem:[%s7819_s8 + $0xd8] sm:$0xff] %v517_v56  ;;  %v5948_v56 = vld [vmem:[%s7815_s4 + $0x708] sm:$0xff] }
  0xf9   :  { %3805 = vmatpush.bf16.msrb.mxu2 %v5920_v34  ;;  %3792 = vmatpush.bf16.msrb.mxu1 %v5912_v41  ;;  %v485_v0 = vpop.f32.mrf.mxu3  ;;  %v5950_v41 = vld [vmem:[%s7815_s4 + $0x718] sm:$0xff] }
  0xfa   :  { %3783 = vmatpush.bf16.msrb.mxu0 %v5900_v49  ;;  %v7380_v0 = vld [vmem:[#allocation1 + $0x36] sm:$0xff] }
  0xfb   :  { %3771 = vmatpush.bf16.msrb.mxu3 %v5891_v6  ;;  %v3502_v3 = vpop.f32.mrf.mxu2  ;;  %v5942_v6 = vld [vmem:[%s7815_s4 + $0x6d8] sm:$0xff] }
  0xfc   :  { %v519_v4 = vpop.f32.mrf.mxu1  ;;  %v5940_v3 = vld [vmem:[%s7815_s4 + $0x6c8] sm:$0xff] }
  0xfd   :  { %3806 = vmatpush.bf16.msrb.mxu2 %v5919_v42  ;;  %3793 = vmatpush.bf16.msrb.mxu1 %v5911_v46  ;;  %v520_v8 = vadd.f32 %v519_v4, %v6739_v21  ;;  %v3501_v21 = vadd.f32 %v6083_v2, %v3500_v51  ;;  %v3526_v14 = vpop.f32.mrf.mxu0  ;;  %v5970_v51 = vld [vmem:[%s7815_s4 + $0x7b8] sm:$0xff]  ;;  %v5969_v2 = vld [vmem:[%s7815_s4 + $0x7b0] sm:$0xff] }
  0xfe   :  { %3772 = vmatmul.bf16.vlgmr.msrb.gmra.mxu3 %v7124_v5  ;;  %3784 = vmatpush.bf16.msrb.mxu0 %v5899_v60  ;;  %v5908_v5 = vld [vmem:[%s7815_s4 + $0x5c8] sm:$0xff]  ;;  %v1313_v60 = vld [vmem:[#allocation1 + $0x12] sm:$0xff] }
  0xff   :  { %3816 = vmatpush.bf16.msra.mxu3 %v5930_v10  ;;  %564 = vst [vmem:[%s7819_s8 + $0x148] sm:$0xf] %v520_v8  ;;  %v5961_v10 = vld [vmem:[%s7815_s4 + $0x770] sm:$0xff]  ;;  %v5959_v8 = vld [vmem:[%s7815_s4 + $0x760] sm:$0xff] }
 0x101   :  { %3807 = vmatpush.bf16.msrb.mxu2 %v5918_v47  ;;  %3794 = vmatpush.bf16.msrb.mxu1 %v5910_v54  ;;  %v3513_v17 = vpop.f32.mrf.mxu3  ;;  %v5949_v47 = vld [vmem:[%s7815_s4 + $0x710] sm:$0xff] }
 0x102   :  { %3829 = vmatpush.bf16.msra.mxu0 %v5938_v25  ;;  %v3514_v19 = vadd.f32 %v3513_v17, %v3501_v21  ;;  %v5941_v54 = vld [vmem:[%s7815_s4 + $0x6d0] sm:$0xff]  ;;  %v1315_v25 = vld [vmem:[#allocation1 + $0x24] sm:$0xff] }
 0x103   :  { %3817 = vmatpush.bf16.msra.mxu3 %v5929_v59  ;;  %3785 = vmatmul.bf16.vlgmr.msrb.gmra.mxu0 %v7126_v7  ;;  %v5907_v7 = vld [vmem:[%s7815_s4 + $0x5c0] sm:$0xff]  ;;  %v3552_v27 = vpop.f32.mrf.mxu2 }
 0x104   :  { %v521_v22 = vpop.f32.mrf.mxu1  ;;  %v3527_v23 = vadd.f32 %v3526_v14, %v3514_v19  ;;  %v5958_v14 = vld [vmem:[%s7815_s4 + $0x758] sm:$0xff]  ;;  %v5967_v17 = vld [vmem:[%s7815_s4 + $0x7a0] sm:$0xff] }
 0x105   :  { %3808 = vmatpush.bf16.msrb.mxu2 %v5917_v58  ;;  %3795 = vmatpush.bf16.msrb.mxu1 %v5909_v61  ;;  %v3528_v30 = vpop.f32.mrf.mxu0  ;;  %v5960_v58 = vld [vmem:[%s7815_s4 + $0x768] sm:$0xff]  ;;  %v5977_v22 = vld [vmem:[%s7815_s4 + $0x7f0] sm:$0xff] }
 0x106   :  { %3830 = vmatpush.bf16.msra.mxu0 %v5937_v1  ;;  %v5976_v30 = vld [vmem:[%s7815_s4 + $0x7e8] sm:$0xff] }
 0x107   :  { %3818 = vmatpush.bf16.msra.mxu3 %v5928_v37  ;;  %v7378_v37 = vld [vmem:[#allocation1 + $0x2d] sm:$0xff] }
 0x109   :  { %3809 = vmatpush.bf16.msrb.mxu2 %v5916_v62  ;;  %3796 = vmatpush.bf16.msrb.mxu1 %v5908_v5  ;;  %v3515_v34 = vpop.f32.mrf.mxu3  ;;  %v1314_v62 = vld [vmem:[#allocation1 + $0x1b] sm:$0xff] }
 0x10a   :  { %3831 = vmatpush.bf16.msra.mxu0 %v5936_v13  ;;  %1320 = vst [vmem:[#allocation1] ss:$9 sm:$0xff] %v569_v52  ;;  %v5947_v5 = vld [vmem:[%s7815_s4 + $0x700] sm:$0xff] }
 0x10b   :  { %3819 = vmatpush.bf16.msra.mxu3 %v5927_v11  ;;  %v3554_v40 = vpop.f32.mrf.mxu2  ;;  %v5939_v13 = vld [vmem:[%s7815_s4 + $0x6c0] sm:$0xff] }
 0x10c   :  { %v3539_v36 = vpop.f32.mrf.mxu1  ;;  %v5964_v40 = vld [vmem:[%s7815_s4 + $0x788] sm:$0xff] }
 0x10d   :  { %3810 = vmatpush.bf16.msrb.mxu2 %v5915_v9  ;;  %3797 = vmatpush.bf16.msrb.mxu1 %v5907_v7  ;;  %v3540_v38 = vadd.f32 %v3539_v36, %v3527_v23  ;;  %v3578_v44 = vpop.f32.mrf.mxu0  ;;  %v5986_v9 = vld [vmem:[%s7815_s4 + $0x838] sm:$0xff] }
 0x10e   :  { %3832 = vmatpush.bf16.msra.mxu0 %v5935_v20  ;;  %v5978_v7 = vld [vmem:[%s7815_s4 + $0x7f8] sm:$0xff]  ;;  %v5957_v20 = vld [vmem:[%s7815_s4 + $0x750] sm:$0xff] }
 0x10f   :  { %3820 = vmatpush.bf16.msra.mxu3 %v5926_v15  ;;  %v3553_v42 = vadd.f32 %v3552_v27, %v3540_v38  ;;  %v5966_v27 = vld [vmem:[%s7815_s4 + $0x798] sm:$0xff] }
 0x110   :  { %3811 = vmatmul.bf16.vlgmr.msrb.gmra.mxu2 %v1311_v63  ;;  %3798 = vmatmul.bf16.vlgmr.msrb.gmra.mxu1 %v7103_v55  ;;  %v5951_v55 = vld [vmem:[%s7815_s4 + $0x720] sm:$0xff]  ;;  %v5982_v38 = vld [vmem:[%s7815_s4 + $0x818] sm:$0xff] }
 0x111   :  { %3855 = vmatpush.bf16.msra.mxu2 %v5954_v12  ;;  %3842 = vmatpush.bf16.msra.mxu1 %v5946_v16  ;;  %v3565_v46 = vpop.f32.mrf.mxu3  ;;  %v5968_v12 = vld [vmem:[%s7815_s4 + $0x7a8] sm:$0xff]  ;;  %v5985_v16 = vld [vmem:[%s7815_s4 + $0x830] sm:$0xff]  ;;  %v1321_v52 = vld [vmem:[#allocation1] sm:$0xff] }
 0x112   :  { %3833 = vmatpush.bf16.msra.mxu0 %v5934_v29  ;;  %v3566_v49 = vadd.f32 %v3565_v46, %v3553_v42  ;;  %v5956_v29 = vld [vmem:[%s7815_s4 + $0x748] sm:$0xff]  ;;  %v5981_v42 = vld [vmem:[%s7815_s4 + $0x810] sm:$0xff]  ;;  %v6002_v46 = vld [vmem:[%s7815_s4 + $0x8b8] sm:$0xff] }
 0x113   :  { %3821 = vmatpush.bf16.msra.mxu3 %v5925_v24  ;;  %v3604_v61 = vpop.f32.mrf.mxu2  ;;  %v5984_v24 = vld [vmem:[%s7815_s4 + $0x828] sm:$0xff] }
 0x114   :  { %v3541_v53 = vpop.f32.mrf.mxu1  ;;  %v3579_v59 = vadd.f32 %v3578_v44, %v3566_v49  ;;  %v5992_v49 = vld [vmem:[%s7815_s4 + $0x868] sm:$0xff] }
 0x115   :  { %3856 = vmatpush.bf16.msra.mxu2 %v5953_v18  ;;  %3843 = vmatpush.bf16.msra.mxu1 %v5945_v26  ;;  %v3580_v1 = vpop.f32.mrf.mxu0  ;;  %v5972_v53 = vld [vmem:[%s7815_s4 + $0x7c8] sm:$0xff] }
 0x116   :  { %3834 = vmatpush.bf16.msra.mxu0 %v5933_v35  ;;  %v5975_v35 = vld [vmem:[%s7815_s4 + $0x7e0] sm:$0xff] }
 0x117   :  { %3822 = vmatpush.bf16.msra.mxu3 %v5924_v31  ;;  %v5983_v31 = vld [vmem:[%s7815_s4 + $0x820] sm:$0xff] }
 0x119   :  { %3857 = vmatpush.bf16.msra.mxu2 %v5952_v28  ;;  %3844 = vmatpush.bf16.msra.mxu1 %v5944_v32  ;;  %v3567_v4 = vpop.f32.mrf.mxu3  ;;  %v5965_v32 = vld [vmem:[%s7815_s4 + $0x790] sm:$0xff] }
 0x11a   :  { %3835 = vmatpush.bf16.msra.mxu0 %v5932_v43  ;;  %v5993_v43 = vld [vmem:[%s7815_s4 + $0x870] sm:$0xff] }
 0x11b   :  { %3823 = vmatpush.bf16.msra.mxu3 %v5923_v57  ;;  %v3606_v63 = vpop.f32.mrf.mxu2  ;;  %v5994_v57 = vld [vmem:[%s7815_s4 + $0x878] sm:$0xff] }
 0x11c   :  { %v3591_v11 = vpop.f32.mrf.mxu1 }
 0x11d   :  { %3858 = vmatpush.bf16.msra.mxu2 %v5951_v55  ;;  %3845 = vmatpush.bf16.msra.mxu1 %v5943_v39  ;;  %v3592_v21 = vadd.f32 %v3591_v11, %v3579_v59  ;;  %v5955_v55 = vld [vmem:[%s7815_s4 + $0x740] sm:$0xff] }
 0x11e   :  { %3824 = vmatmul.bf16.vlgmr.msra.gmra.mxu3 %v1312_v45  ;;  %3836 = vmatpush.bf16.msra.mxu0 %v5931_v50  ;;  %v5963_v45 = vld [vmem:[%s7815_s4 + $0x780] sm:$0xff] }
 0x11f   :  { %3868 = vmatpush.bf16.msrb.mxu3 %v5962_v33  ;;  %v3605_v15 = vadd.f32 %v3604_v61, %v3592_v21  ;;  %v5974_v33 = vld [vmem:[%s7815_s4 + $0x7d8] sm:$0xff]  ;;  %v6008_v21 = vld [vmem:[%s7815_s4 + $0x8e8] sm:$0xff] }
 0x120   :  { %v3630_v18 = vpop.f32.mrf.mxu0  ;;  %v5990_v61 = vld [vmem:[%s7815_s4 + $0x858] sm:$0xff] }
 0x121   :  { %3859 = vmatpush.bf16.msra.mxu2 %v5950_v41  ;;  %3846 = vmatpush.bf16.msra.mxu1 %v5942_v6  ;;  %v3617_v19 = vpop.f32.mrf.mxu3 }
 0x122   :  { %3881 = vmatpush.bf16.msrb.mxu0 %v5970_v51  ;;  %v3618_v23 = vadd.f32 %v3617_v19, %v3605_v15  ;;  %v6001_v51 = vld [vmem:[%s7815_s4 + $0x8b0] sm:$0xff]  ;;  %v6014_v15 = vld [vmem:[%s7815_s4 + $0x918] sm:$0xff] }
 0x123   :  { %3869 = vmatpush.bf16.msrb.mxu3 %v5961_v10  ;;  %3837 = vmatmul.bf16.vlgmr.msra.gmra.mxu0 %v1313_v60  ;;  %v5980_v10 = vld [vmem:[%s7815_s4 + $0x808] sm:$0xff] }
 0x124   :  { %v3593_v26 = vpop.f32.mrf.mxu1  ;;  %v3631_v28 = vadd.f32 %v3630_v18, %v3618_v23  ;;  %v6000_v60 = vld [vmem:[%s7815_s4 + $0x8a8] sm:$0xff]  ;;  %v6006_v23 = vld [vmem:[%s7815_s4 + $0x8d8] sm:$0xff] }
 0x125   :  { %3860 = vmatpush.bf16.msra.mxu2 %v5949_v47  ;;  %3847 = vmatpush.bf16.msra.mxu1 %v5941_v54  ;;  %v5973_v47 = vld [vmem:[%s7815_s4 + $0x7d0] sm:$0xff]  ;;  %v5979_v54 = vld [vmem:[%s7815_s4 + $0x800] sm:$0xff]  ;;  %v5996_v18 = vld [vmem:[%s7815_s4 + $0x888] sm:$0xff] }
 0x126   :  { %3882 = vmatpush.bf16.msrb.mxu0 %v5969_v2  ;;  %v5989_v2 = vld [vmem:[%s7815_s4 + $0x850] sm:$0xff] }
 0x127   :  { %3870 = vmatpush.bf16.msrb.mxu3 %v5960_v58  ;;  %v6018_v58 = vld [vmem:[%s7815_s4 + $0x938] sm:$0xff]  ;;  %v6025_v26 = vld [vmem:[%s7815_s4 + $0x970] sm:$0xff] }
 0x128   :  { %v3632_v34 = vpop.f32.mrf.mxu0 }
 0x129   :  { %3861 = vmatpush.bf16.msra.mxu2 %v5948_v56  ;;  %3848 = vmatpush.bf16.msra.mxu1 %v5940_v3  ;;  %v3619_v36 = vpop.f32.mrf.mxu3  ;;  %v5991_v56 = vld [vmem:[%s7815_s4 + $0x860] sm:$0xff]  ;;  %v6009_v3 = vld [vmem:[%s7815_s4 + $0x8f0] sm:$0xff]  ;;  %v6012_v34 = vld [vmem:[%s7815_s4 + $0x908] sm:$0xff] }
 0x12a   :  { %3883 = vmatpush.bf16.msrb.mxu0 %v5968_v12  ;;  %v5988_v12 = vld [vmem:[%s7815_s4 + $0x848] sm:$0xff] }
 0x12b   :  { %3871 = vmatpush.bf16.msrb.mxu3 %v5959_v8  ;;  %v6016_v8 = vld [vmem:[%s7815_s4 + $0x928] sm:$0xff] }
 0x12c   :  { %v1325_v36 = vld [vmem:[#allocation1 + $0x24] sm:$0xff] }
 0x12d   :  { %3862 = vmatpush.bf16.msra.mxu2 %v5947_v5  ;;  %3849 = vmatpush.bf16.msra.mxu1 %v5939_v13  ;;  %v3643_v39 = vpop.f32.mrf.mxu1  ;;  %v5997_v13 = vld [vmem:[%s7815_s4 + $0x890] sm:$0xff] }
 0x12e   :  { %3884 = vmatpush.bf16.msrb.mxu0 %v5967_v17  ;;  %v3644_v41 = vadd.f32 %v3643_v39, %v3631_v28  ;;  %v7581_v39 = vld [vmem:[#allocation1 + $0x2d] sm:$0xff] }
 0x12f   :  { %3872 = vmatpush.bf16.msrb.mxu3 %v5958_v14  ;;  %v5987_v14 = vld [vmem:[%s7815_s4 + $0x840] sm:$0xff] }
 0x130   :  { %3863 = vmatmul.bf16.vlgmr.msra.gmra.mxu2 %v1315_v25  ;;  %3850 = vmatmul.bf16.vlgmr.msra.gmra.mxu1 %v1314_v62  ;;  %v5971_v25 = vld [vmem:[%s7815_s4 + $0x7c0] sm:$0xff]  ;;  %v6010_v62 = vld [vmem:[%s7815_s4 + $0x8f8] sm:$0xff] }
 0x131   :  { %3907 = vmatpush.bf16.msrb.mxu2 %v5986_v9  ;;  %3894 = vmatpush.bf16.msrb.mxu1 %v5978_v7  ;;  %v5998_v9 = vld [vmem:[%s7815_s4 + $0x898] sm:$0xff]  ;;  %v6007_v7 = vld [vmem:[%s7815_s4 + $0x8e0] sm:$0xff] }
 0x132   :  { %3885 = vmatpush.bf16.msrb.mxu0 %v5966_v27  ;;  %v7562_v27 = vld [vmem:[#allocation1 + $0x3f] sm:$0xff] }
 0x133   :  { %3873 = vmatpush.bf16.msrb.mxu3 %v5957_v20  ;;  %v3656_v44 = vpop.f32.mrf.mxu2 }
 0x134   :  { %v3657_v6 = vadd.f32 %v3656_v44, %v3644_v41  ;;  %v6033_v41 = vld [vmem:[%s7815_s4 + $0x9b0] sm:$0xff]  ;;  %v6023_v44 = vld [vmem:[%s7815_s4 + $0x960] sm:$0xff] }
 0x135   :  { %3908 = vmatpush.bf16.msrb.mxu2 %v5985_v16  ;;  %3895 = vmatpush.bf16.msrb.mxu1 %v5977_v22  ;;  %v3645_v50 = vpop.f32.mrf.mxu1  ;;  %v6026_v16 = vld [vmem:[%s7815_s4 + $0x978] sm:$0xff]  ;;  %v1322_v22 = vld [vmem:[#allocation1 + $0x9] sm:$0xff] }
 0x136   :  { %3886 = vmatpush.bf16.msrb.mxu0 %v5965_v32  ;;  %v6005_v32 = vld [vmem:[%s7815_s4 + $0x8d0] sm:$0xff] }
 0x137   :  { %3874 = vmatpush.bf16.msrb.mxu3 %v5956_v29  ;;  %v5995_v29 = vld [vmem:[%s7815_s4 + $0x880] sm:$0xff]  ;;  %v6049_v50 = vld [vmem:[%s7815_s4 + $0xa30] sm:$0xff] }
 0x139   :  { %3909 = vmatpush.bf16.msrb.mxu2 %v5984_v24  ;;  %3896 = vmatpush.bf16.msrb.mxu1 %v5976_v30  ;;  %v6013_v24 = vld [vmem:[%s7815_s4 + $0x910] sm:$0xff]  ;;  %v6034_v30 = vld [vmem:[%s7815_s4 + $0x9b8] sm:$0xff] }
 0x13a   :  { %3887 = vmatpush.bf16.msrb.mxu0 %v5964_v40  ;;  %v570_v40 = vld [vmem:[%s7812_s1 + $0x28] sm:$0xf] }
 0x13b   :  { %3875 = vmatpush.bf16.msrb.mxu3 %v5955_v55  ;;  %v3658_v59 = vpop.f32.mrf.mxu2  ;;  %v6024_v55 = vld [vmem:[%s7815_s4 + $0x968] sm:$0xff] }
 0x13d   :  { %3910 = vmatpush.bf16.msrb.mxu2 %v5983_v31  ;;  %3897 = vmatpush.bf16.msrb.mxu1 %v5975_v35  ;;  %v1323_v35 = vld [vmem:[#allocation1 + $0x12] sm:$0xff] }
 0x13e   :  { %3876 = vmatmul.bf16.vlgmr.msrb.gmra.mxu3 %v7378_v37  ;;  %3888 = vmatpush.bf16.msrb.mxu0 %v5963_v45  ;;  %v6017_v37 = vld [vmem:[%s7815_s4 + $0x930] sm:$0xff]  ;;  %v6050_v45 = vld [vmem:[%s7815_s4 + $0xa38] sm:$0xff] }
 0x13f   :  { %3920 = vmatpush.bf16.msra.mxu3 %v5994_v57  ;;  %v1324_v57 = vld [vmem:[#allocation1 + $0x1b] sm:$0xff] }
 0x140   :  { %v3682_v5 = vpop.f32.mrf.mxu0 }
 0x141   :  { %3911 = vmatpush.bf16.msrb.mxu2 %v5982_v38  ;;  %3898 = vmatpush.bf16.msrb.mxu1 %v5974_v33  ;;  %v3669_v1 = vpop.f32.mrf.mxu3  ;;  %v7579_v38 = vld [vmem:[#allocation1 + $0x36] sm:$0xff] }
 0x142   :  { %3933 = vmatpush.bf16.msra.mxu0 %v6002_v46  ;;  %v3670_v4 = vadd.f32 %v3669_v1, %v3657_v6  ;;  %1330 = vst [vmem:[#allocation1] ss:$9 sm:$0xff] %v570_v40  ;;  %v6032_v46 = vld [vmem:[%s7815_s4 + $0x9a8] sm:$0xff]  ;;  %v6019_v1 = vld [vmem:[%s7815_s4 + $0x940] sm:$0xff] }
 0x143   :  { %3921 = vmatpush.bf16.msra.mxu3 %v5993_v43  ;;  %3889 = vmatmul.bf16.vlgmr.msrb.gmra.mxu0 %v7380_v0  ;;  %v5999_v0 = vld [vmem:[%s7815_s4 + $0x8a0] sm:$0xff] }
 0x144   :  { %v3683_v11 = vadd.f32 %v3682_v5, %v3670_v4  ;;  %v6011_v43 = vld [vmem:[%s7815_s4 + $0x900] sm:$0xff]  ;;  %v6058_v4 = vld [vmem:[%s7815_s4 + $0xa78] sm:$0xff] }
 0x145   :  { %3912 = vmatpush.bf16.msrb.mxu2 %v5981_v42  ;;  %3899 = vmatpush.bf16.msrb.mxu1 %v5973_v47  ;;  %v6004_v42 = vld [vmem:[%s7815_s4 + $0x8c8] sm:$0xff]  ;;  %v6003_v47 = vld [vmem:[%s7815_s4 + $0x8c0] sm:$0xff] }
 0x146   :  { %3934 = vmatpush.bf16.msra.mxu0 %v6001_v51  ;;  %v6031_v51 = vld [vmem:[%s7815_s4 + $0x9a0] sm:$0xff] }
 0x147   :  { %3922 = vmatpush.bf16.msra.mxu3 %v5992_v49  ;;  %v6042_v49 = vld [vmem:[%s7815_s4 + $0x9f8] sm:$0xff] }
 0x148   :  { %v3684_v17 = vpop.f32.mrf.mxu0 }
 0x149   :  { %3913 = vmatpush.bf16.msrb.mxu2 %v5980_v10  ;;  %3900 = vmatpush.bf16.msrb.mxu1 %v5972_v53  ;;  %v3671_v63 = vpop.f32.mrf.mxu3  ;;  %v6022_v10 = vld [vmem:[%s7815_s4 + $0x958] sm:$0xff]  ;;  %v6021_v53 = vld [vmem:[%s7815_s4 + $0x950] sm:$0xff]  ;;  %v6044_v17 = vld [vmem:[%s7815_s4 + $0xa08] sm:$0xff] }
 0x14a   :  { %3935 = vmatpush.bf16.msra.mxu0 %v6000_v60 }
 0x14b   :  { %3923 = vmatpush.bf16.msra.mxu3 %v5991_v56 }
 0x14d   :  { %3914 = vmatpush.bf16.msrb.mxu2 %v5979_v54  ;;  %3901 = vmatpush.bf16.msrb.mxu1 %v5971_v25  ;;  %v3695_v19 = vpop.f32.mrf.mxu1  ;;  %v6041_v54 = vld [vmem:[%s7815_s4 + $0x9f0] sm:$0xff]  ;;  %v6030_v25 = vld [vmem:[%s7815_s4 + $0x998] sm:$0xff] }
 0x14e   :  { %3936 = vmatpush.bf16.msra.mxu0 %v5999_v0  ;;  %v3696_v20 = vadd.f32 %v3695_v19, %v3683_v11  ;;  %v6029_v0 = vld [vmem:[%s7815_s4 + $0x990] sm:$0xff] }
 0x14f   :  { %3924 = vmatpush.bf16.msra.mxu3 %v5990_v61  ;;  %v6020_v61 = vld [vmem:[%s7815_s4 + $0x948] sm:$0xff]  ;;  %v6065_v19 = vld [vmem:[%s7815_s4 + $0xab0] sm:$0xff] }
 0x150   :  { %3915 = vmatmul.bf16.vlgmr.msrb.gmra.mxu2 %v1321_v52  ;;  %3902 = vmatmul.bf16.vlgmr.msrb.gmra.mxu1 %v7358_v48  ;;  %v6015_v48 = vld [vmem:[%s7815_s4 + $0x920] sm:$0xff] }
 0x151   :  { %3959 = vmatpush.bf16.msra.mxu2 %v6018_v58  ;;  %3946 = vmatpush.bf16.msra.mxu1 %v6010_v62  ;;  %v6048_v58 = vld [vmem:[%s7815_s4 + $0xa28] sm:$0xff] }
 0x152   :  { %3937 = vmatpush.bf16.msra.mxu0 %v5998_v9  ;;  %v6040_v62 = vld [vmem:[%s7815_s4 + $0x9e8] sm:$0xff] }
 0x153   :  { %3925 = vmatpush.bf16.msra.mxu3 %v5989_v2  ;;  %v3708_v28 = vpop.f32.mrf.mxu2  ;;  %v6039_v2 = vld [vmem:[%s7815_s4 + $0x9e0] sm:$0xff] }
 0x154   :  { %v3709_v31 = vadd.f32 %v3708_v28, %v3696_v20  ;;  %v6064_v28 = vld [vmem:[%s7815_s4 + $0xaa8] sm:$0xff] }
 0x155   :  { %3960 = vmatpush.bf16.msra.mxu2 %v6017_v37  ;;  %3947 = vmatpush.bf16.msra.mxu1 %v6009_v3  ;;  %v3697_v33 = vpop.f32.mrf.mxu1  ;;  %v6047_v37 = vld [vmem:[%s7815_s4 + $0xa20] sm:$0xff]  ;;  %v6046_v3 = vld [vmem:[%s7815_s4 + $0xa18] sm:$0xff] }
 0x156   :  { %3938 = vmatpush.bf16.msra.mxu0 %v5997_v13  ;;  %v6057_v13 = vld [vmem:[%s7815_s4 + $0xa70] sm:$0xff]  ;;  %v6072_v33 = vld [vmem:[%s7815_s4 + $0xae8] sm:$0xff] }
 0x157   :  { %3926 = vmatpush.bf16.msra.mxu3 %v5988_v12 }
 0x159   :  { %3961 = vmatpush.bf16.msra.mxu2 %v6016_v8  ;;  %3948 = vmatpush.bf16.msra.mxu1 %v6008_v21  ;;  %v6028_v8 = vld [vmem:[%s7815_s4 + $0x988] sm:$0xff]  ;;  %v6038_v21 = vld [vmem:[%s7815_s4 + $0x9d8] sm:$0xff] }
 0x15a   :  { %3939 = vmatpush.bf16.msra.mxu0 %v5996_v18  ;;  %v6056_v18 = vld [vmem:[%s7815_s4 + $0xa68] sm:$0xff] }
 0x15b   :  { %3927 = vmatpush.bf16.msra.mxu3 %v5987_v14  ;;  %v3710_v6 = vpop.f32.mrf.mxu2 }
 0x15d   :  { %3962 = vmatpush.bf16.msra.mxu2 %v6015_v48  ;;  %3949 = vmatpush.bf16.msra.mxu1 %v6007_v7  ;;  %v6045_v48 = vld [vmem:[%s7815_s4 + $0xa10] sm:$0xff]  ;;  %v6027_v7 = vld [vmem:[%s7815_s4 + $0x980] sm:$0xff] }
 0x15e   :  { %3928 = vmatmul.bf16.vlgmr.msra.gmra.mxu3 %v1322_v22  ;;  %3940 = vmatpush.bf16.msra.mxu0 %v5995_v29  ;;  %v6036_v22 = vld [vmem:[%s7815_s4 + $0x9c8] sm:$0xff]  ;;  %v6035_v29 = vld [vmem:[%s7815_s4 + $0x9c0] sm:$0xff] }
 0x15f   :  { %3972 = vmatpush.bf16.msrb.mxu3 %v6026_v16  ;;  %v6037_v16 = vld [vmem:[%s7815_s4 + $0x9d0] sm:$0xff] }
 0x160   :  { %v3734_v60 = vpop.f32.mrf.mxu0 }
 0x161   :  { %3963 = vmatpush.bf16.msra.mxu2 %v6014_v15  ;;  %3950 = vmatpush.bf16.msra.mxu1 %v6006_v23  ;;  %v3721_v56 = vpop.f32.mrf.mxu3  ;;  %v6066_v15 = vld [vmem:[%s7815_s4 + $0xab8] sm:$0xff]  ;;  %v6043_v23 = vld [vmem:[%s7815_s4 + $0xa00] sm:$0xff] }
 0x162   :  { %3985 = vmatpush.bf16.msrb.mxu0 %v6034_v30  ;;  %v3722_v59 = vadd.f32 %v3721_v56, %v3709_v31  ;;  %v1331_v30 = vld [vmem:[#allocation1] sm:$0xff]  ;;  %v6054_v31 = vld [vmem:[%s7815_s4 + $0xa58] sm:$0xff] }
 0x163   :  { %3973 = vmatpush.bf16.msrb.mxu3 %v6025_v26  ;;  %3941 = vmatmul.bf16.vlgmr.msra.gmra.mxu0 %v1323_v35  ;;  %v6073_v35 = vld [vmem:[%s7815_s4 + $0xaf0] sm:$0xff] }
 0x164   :  { %v3735_v52 = vadd.f32 %v3734_v60, %v3722_v59  ;;  %v1333_v56 = vld [vmem:[#allocation1 + $0x12] sm:$0xff]  ;;  %v6068_v59 = vld [vmem:[%s7815_s4 + $0xac8] sm:$0xff] }
 0x165   :  { %3964 = vmatpush.bf16.msra.mxu2 %v6013_v24  ;;  %3951 = vmatpush.bf16.msra.mxu1 %v6005_v32  ;;  %v6055_v24 = vld [vmem:[%s7815_s4 + $0xa60] sm:$0xff]  ;;  %v6074_v32 = vld [vmem:[%s7815_s4 + $0xaf8] sm:$0xff] }
 0x166   :  { %3986 = vmatpush.bf16.msrb.mxu0 %v6033_v41  ;;  %v6052_v41 = vld [vmem:[%s7815_s4 + $0xa48] sm:$0xff] }
 0x167   :  { %3974 = vmatpush.bf16.msrb.mxu3 %v6024_v55  ;;  %v6053_v55 = vld [vmem:[%s7815_s4 + $0xa50] sm:$0xff] }
 0x168   :  { %v3736_v9 = vpop.f32.mrf.mxu0 }
 0x169   :  { %3965 = vmatpush.bf16.msra.mxu2 %v6012_v34  ;;  %3952 = vmatpush.bf16.msra.mxu1 %v6004_v42  ;;  %v3723_v5 = vpop.f32.mrf.mxu3  ;;  %v6063_v34 = vld [vmem:[%s7815_s4 + $0xaa0] sm:$0xff] }
 0x16a   :  { %3987 = vmatpush.bf16.msrb.mxu0 %v6032_v46  ;;  %v6051_v42 = vld [vmem:[%s7815_s4 + $0xa40] sm:$0xff] }
 0x16b   :  { %3975 = vmatpush.bf16.msrb.mxu3 %v6023_v44 }
 0x16d   :  { %3966 = vmatpush.bf16.msra.mxu2 %v6011_v43  ;;  %3953 = vmatpush.bf16.msra.mxu1 %v6003_v47  ;;  %v3747_v11 = vpop.f32.mrf.mxu1  ;;  %v6071_v43 = vld [vmem:[%s7815_s4 + $0xae0] sm:$0xff] }
 0x16e   :  { %3988 = vmatpush.bf16.msrb.mxu0 %v6031_v51  ;;  %v3748_v12 = vadd.f32 %v3747_v11, %v3735_v52  ;;  %v6059_v51 = vld [vmem:[%s7815_s4 + $0xa80] sm:$0xff] }
 0x16f   :  { %3976 = vmatpush.bf16.msrb.mxu3 %v6022_v10  ;;  %v1332_v10 = vld [vmem:[#allocation1 + $0x9] sm:$0xff]  ;;  %v1334_v52 = vld [vmem:[#allocation1 + $0x1b] sm:$0xff] }
 0x170   :  { %3967 = vmatmul.bf16.vlgmr.msra.gmra.mxu2 %v1325_v36  ;;  %3954 = vmatmul.bf16.vlgmr.msra.gmra.mxu1 %v1324_v57 }
 0x171   :  { %4011 = vmatpush.bf16.msrb.mxu2 %v6050_v45  ;;  %3998 = vmatpush.bf16.msrb.mxu1 %v6042_v49  ;;  %v6060_v45 = vld [vmem:[%s7815_s4 + $0xa88] sm:$0xff]  ;;  %v6070_v49 = vld [vmem:[%s7815_s4 + $0xad8] sm:$0xff] }
 0x172   :  { %3989 = vmatpush.bf16.msrb.mxu0 %v6030_v25  ;;  %v6067_v25 = vld [vmem:[%s7815_s4 + $0xac0] sm:$0xff] }
 0x173   :  { %3977 = vmatpush.bf16.msrb.mxu3 %v6021_v53  ;;  %v3760_v14 = vpop.f32.mrf.mxu2 }
 0x174   :  { %v3761_v63 = vadd.f32 %v3760_v14, %v3748_v12 }
 0x175   :  { %4012 = vmatpush.bf16.msrb.mxu2 %v6049_v50  ;;  %3999 = vmatpush.bf16.msrb.mxu1 %v6041_v54  ;;  %v3749_v20 = vpop.f32.mrf.mxu1  ;;  %v6069_v54 = vld [vmem:[%s7815_s4 + $0xad0] sm:$0xff] }
 0x176   :  { %3990 = vmatpush.bf16.msrb.mxu0 %v6029_v0  ;;  %v4079_v20 = vld [vmem:[%s7817_s6 + $0x78] sm:$0xff] }
 0x177   :  { %3978 = vmatpush.bf16.msrb.mxu3 %v6020_v61 }
 0x179   :  { %4013 = vmatpush.bf16.msrb.mxu2 %v6048_v58  ;;  %4000 = vmatpush.bf16.msrb.mxu1 %v6040_v62 }
 0x17a   :  { %3991 = vmatpush.bf16.msrb.mxu0 %v6028_v8 }
 0x17b   :  { %3979 = vmatpush.bf16.msrb.mxu3 %v6019_v1  ;;  %v3762_v26 = vpop.f32.mrf.mxu2 }
 0x17d   :  { %4014 = vmatpush.bf16.msrb.mxu2 %v6047_v37  ;;  %4001 = vmatpush.bf16.msrb.mxu1 %v6039_v2 }
 0x17e   :  { %3980 = vmatmul.bf16.vlgmr.msrb.gmra.mxu3 %v7581_v39  ;;  %3992 = vmatpush.bf16.msrb.mxu0 %v6027_v7  ;;  %v6062_v39 = vld [vmem:[%s7815_s4 + $0xa98] sm:$0xff] }
 0x17f   :  { %4024 = vmatpush.bf16.msra.mxu3 %v6058_v4 }
 0x180   :  { %v3786_v57 = vpop.f32.mrf.mxu0 }
 0x181   :  { %4015 = vmatpush.bf16.msrb.mxu2 %v6046_v3  ;;  %4002 = vmatpush.bf16.msrb.mxu1 %v6038_v21  ;;  %v3773_v36 = vpop.f32.mrf.mxu3 }
 0x182   :  { %4037 = vmatpush.bf16.msra.mxu0 %v6066_v15 }
 0x183   :  { %4025 = vmatpush.bf16.msra.mxu3 %v6057_v13  ;;  %3993 = vmatmul.bf16.vlgmr.msrb.gmra.mxu0 %v7579_v38  ;;  %v3774_v38 = vadd.f32 %v3773_v36, %v3761_v63 }
 0x185   :  { %4016 = vmatpush.bf16.msrb.mxu2 %v6045_v48  ;;  %4003 = vmatpush.bf16.msrb.mxu1 %v6037_v16  ;;  %v3787_v40 = vadd.f32 %v3786_v57, %v3774_v38  ;;  %v4071_v38 = vld [vmem:[%s7817_s6 + $0x38] sm:$0xff]  ;;  %v4070_v57 = vld [vmem:[%s7817_s6 + $0x30] sm:$0xff] }
 0x186   :  { %4038 = vmatpush.bf16.msra.mxu0 %v6065_v19 }
 0x187   :  { %4026 = vmatpush.bf16.msra.mxu3 %v6056_v18 }
 0x188   :  { %v3788_v6 = vpop.f32.mrf.mxu0 }
 0x189   :  { %4017 = vmatpush.bf16.msrb.mxu2 %v6044_v17  ;;  %4004 = vmatpush.bf16.msrb.mxu1 %v6036_v22  ;;  %v3775_v44 = vpop.f32.mrf.mxu3 }
 0x18a   :  { %4039 = vmatpush.bf16.msra.mxu0 %v6064_v28  ;;  %v4077_v28 = vld [vmem:[%s7817_s6 + $0x68] sm:$0xff] }
 0x18b   :  { %4027 = vmatpush.bf16.msra.mxu3 %v6055_v24  ;;  %v4078_v24 = vld [vmem:[%s7817_s6 + $0x70] sm:$0xff]  ;;  %v4065_v44 = vld [vmem:[%s7817_s6 + $0x8] sm:$0xff] }
 0x18d   :  { %4018 = vmatpush.bf16.msrb.mxu2 %v6043_v23  ;;  %4005 = vmatpush.bf16.msrb.mxu1 %v6035_v29  ;;  %v3799_v46 = vpop.f32.mrf.mxu1  ;;  %v4076_v29 = vld [vmem:[%s7817_s6 + $0x60] sm:$0xff] }
 0x18e   :  { %4040 = vmatpush.bf16.msra.mxu0 %v6063_v34  ;;  %v3800_v47 = vadd.f32 %v3799_v46, %v3787_v40  ;;  %v4073_v34 = vld [vmem:[%s7817_s6 + $0x48] sm:$0xff]  ;;  %v4064_v46 = vld [vmem:[%s7817_s6] sm:$0xff] }
 0x18f   :  { %4028 = vmatpush.bf16.msra.mxu3 %v6054_v31  ;;  %v4075_v31 = vld [vmem:[%s7817_s6 + $0x58] sm:$0xff] }
 0x190   :  { %4019 = vmatmul.bf16.vlgmr.msrb.gmra.mxu2 %v1331_v30  ;;  %4006 = vmatmul.bf16.vlgmr.msrb.gmra.mxu1 %v7562_v27  ;;  %v6061_v27 = vld [vmem:[%s7815_s4 + $0xa90] sm:$0xff] }
 0x191   :  { %4050 = vmatpush.bf16.msra.mxu1 %v6074_v32  ;;  %4084 = vmatpush.msra.mxu2 %v4079_v20  ;;  %v4074_v32 = vld [vmem:[%s7817_s6 + $0x50] sm:$0xff] }
 0x192   :  { %4041 = vmatpush.bf16.msra.mxu0 %v6062_v39  ;;  %v4069_v39 = vld [vmem:[%s7817_s6 + $0x28] sm:$0xff] }
 0x193   :  { %4029 = vmatpush.bf16.msra.mxu3 %v6053_v55  ;;  %v3812_v50 = vpop.f32.mrf.mxu2  ;;  %4085 = vmatpush.msra.mxu2 %v4078_v24 }
 0x194   :  { %v3813_v53 = vadd.f32 %v3812_v50, %v3800_v47 }
 0x195   :  { %4051 = vmatpush.bf16.msra.mxu1 %v6073_v35  ;;  %v3801_v58 = vpop.f32.mrf.mxu1  ;;  %4086 = vmatpush.msra.mxu2 %v4077_v28  ;;  %v4072_v35 = vld [vmem:[%s7817_s6 + $0x40] sm:$0xff] }
 0x196   :  { %4042 = vmatpush.bf16.msra.mxu0 %v6061_v27 }
 0x197   :  { %4030 = vmatpush.bf16.msra.mxu3 %v6052_v41  ;;  %4087 = vmatpush.msra.mxu2 %v4076_v29  ;;  %v4068_v41 = vld [vmem:[%s7817_s6 + $0x20] sm:$0xff] }
 0x199   :  { %4052 = vmatpush.bf16.msra.mxu1 %v6072_v33  ;;  %4088 = vmatpush.msra.mxu2 %v4075_v31  ;;  %v4067_v33 = vld [vmem:[%s7817_s6 + $0x18] sm:$0xff] }
 0x19a   :  { %4043 = vmatpush.bf16.msra.mxu0 %v6060_v45 }
 0x19b   :  { %4031 = vmatpush.bf16.msra.mxu3 %v6051_v42  ;;  %v3814_v60 = vpop.f32.mrf.mxu2  ;;  %4089 = vmatpush.msra.mxu2 %v4074_v32 }
 0x19d   :  { %4053 = vmatpush.bf16.msra.mxu1 %v6071_v43  ;;  %4090 = vmatpush.msra.mxu2 %v4073_v34  ;;  %v4066_v43 = vld [vmem:[%s7817_s6 + $0x10] sm:$0xff]  ;;  %s6139_s6 = smov [#allocation2]  }
 0x19e   :  { %4032 = vmatmul.bf16.vlgmr.msra.gmra.mxu3 %v1332_v10  ;;  %4044 = vmatpush.bf16.msra.mxu0 %v6059_v51  ;;  %s4113_s23 = sshll.u32 %s6139_s6, 4  ;;  %s4114_s23 = int_to_ptr.vmem [resolvable:$true] %s4113_s23 }
 0x19f   :  { %4091 = vmatpush.msra.mxu2 %v4072_v35 }
 0x1a0   :  { %v3838_v37 = vpop.f32.mrf.mxu0 }
 0x1a1   :  { %4054 = vmatpush.bf16.msra.mxu1 %v6070_v49  ;;  %4045 = vmatmul.bf16.vlgmr.msra.gmra.mxu0 %v1333_v56  ;;  %v3825_v61 = vpop.f32.mrf.mxu3 }
 0x1a2   :  { %v3826_v62 = vadd.f32 %v3825_v61, %v3813_v53  ;;  %4092 = vmatpush.msra.mxu2 %v4071_v38 }
 0x1a4   :  { %v3839_v0 = vadd.f32 %v3838_v37, %v3826_v62  ;;  %4093 = vmatpush.msra.mxu2 %v4070_v57 }
 0x1a5   :  { %4055 = vmatpush.bf16.msra.mxu1 %v6069_v54 }
 0x1a6   :  { %4094 = vmatpush.msra.mxu2 %v4069_v39 }
 0x1a8   :  { %v3840_v2 = vpop.f32.mrf.mxu0  ;;  %4095 = vmatpush.msra.mxu2 %v4068_v41 }
 0x1a9   :  { %4056 = vmatpush.bf16.msra.mxu1 %v6068_v59  ;;  %v3827_v1 = vpop.f32.mrf.mxu3 }
 0x1aa   :  { %4096 = vmatpush.msra.mxu2 %v4067_v33 }
 0x1ac   :  { %4097 = vmatpush.msra.mxu2 %v4066_v43 }
 0x1ad   :  { %4057 = vmatpush.bf16.msra.mxu1 %v6067_v25  ;;  %v3851_v3 = vpop.f32.mrf.mxu1 }
 0x1ae   :  { %v3852_v4 = vadd.f32 %v3851_v3, %v3839_v0  ;;  %4098 = vmatpush.msra.mxu2 %v4065_v44 }
 0x1b0   :  { %4058 = vmatmul.bf16.vlgmr.msra.gmra.mxu1 %v1334_v52  ;;  %4099 = vmatpush.msra.mxu2 %v4064_v46 }
 0x1b3   :  { %v3864_v5 = vpop.f32.mrf.mxu2 }
 0x1b4   :  { %v3865_v8 = vadd.f32 %v3864_v5, %v3852_v4 }
 0x1b5   :  { %v3853_v9 = vpop.f32.mrf.mxu1 }
 0x1bb   :  { %v3866_v11 = vpop.f32.mrf.mxu2 }
 0x1c0   :  { %v3890_v48 = vpop.f32.mrf.mxu0 }
 0x1c1   :  { %v3877_v12 = vpop.f32.mrf.mxu3 }
 0x1c2   :  { %v3878_v21 = vadd.f32 %v3877_v12, %v3865_v8  ;;  %v6084_v8 = vld [vmem:[%s7818_s7] ss:$0 sm:$0xff] }
 0x1c4   :  { %v3891_v13 = vadd.f32 %v3890_v48, %v3878_v21 }
 0x1c8   :  { %v3892_v7 = vpop.f32.mrf.mxu0 }
 0x1c9   :  { %v3879_v14 = vpop.f32.mrf.mxu3 }
 0x1cd   :  { %v3903_v63 = vpop.f32.mrf.mxu1 }
 0x1ce   :  { %v3904_v42 = vadd.f32 %v3903_v63, %v3891_v13 }
 0x1d3   :  { %v3916_v15 = vpop.f32.mrf.mxu2 }
 0x1d4   :  { %v3917_v45 = vadd.f32 %v3916_v15, %v3904_v42 }
 0x1d5   :  { %v3905_v16 = vpop.f32.mrf.mxu1 }
 0x1db   :  { %v3918_v17 = vpop.f32.mrf.mxu2 }
 0x1e0   :  { %v3942_v19 = vpop.f32.mrf.mxu0 }
 0x1e1   :  { %v3929_v18 = vpop.f32.mrf.mxu3 }
 0x1e2   :  { %v3930_v10 = vadd.f32 %v3929_v18, %v3917_v45 }
 0x1e4   :  { %v3943_v51 = vadd.f32 %v3942_v19, %v3930_v10 }
 0x1e8   :  { %v3944_v23 = vpop.f32.mrf.mxu0 }
 0x1e9   :  { %v3931_v22 = vpop.f32.mrf.mxu3 }
 0x1ed   :  { %v3955_v26 = vpop.f32.mrf.mxu1 }
 0x1ee   :  { %v3956_v53 = vadd.f32 %v3955_v26, %v3943_v51 }
 0x1f3   :  { %v3968_v30 = vpop.f32.mrf.mxu2 }
 0x1f4   :  { %v3969_v56 = vadd.f32 %v3968_v30, %v3956_v53 }
 0x1f5   :  { %v3957_v55 = vpop.f32.mrf.mxu1 }
 0x1fb   :  { %v3970_v36 = vpop.f32.mrf.mxu2 }
 0x200   :  { %v3994_v27 = vpop.f32.mrf.mxu0 }
 0x201   :  { %v3981_v40 = vpop.f32.mrf.mxu3 }
 0x202   :  { %v3982_v59 = vadd.f32 %v3981_v40, %v3969_v56 }
 0x204   :  { %v3995_v60 = vadd.f32 %v3994_v27, %v3982_v59 }
 0x208   :  { %v3996_v47 = vpop.f32.mrf.mxu0 }
 0x209   :  { %v3983_v6 = vpop.f32.mrf.mxu3 }
 0x20d   :  { %v4007_v49 = vpop.f32.mrf.mxu1 }
 0x20e   :  { %v4008_v25 = vadd.f32 %v4007_v49, %v3995_v60 }
 0x213   :  { %v4020_v50 = vpop.f32.mrf.mxu2 }
 0x214   :  { %v4021_v62 = vadd.f32 %v4020_v50, %v4008_v25 }
 0x215   :  { %v4009_v54 = vpop.f32.mrf.mxu1 }
 0x21b   :  { %v4022_v58 = vpop.f32.mrf.mxu2 }
 0x21e   :  { %v4046_v61 = vpop.f32.mrf.mxu0 }
 0x221   :  { %v4033_v52 = vpop.f32.mrf.mxu3 }
 0x222   :  { %v4034_v37 = vadd.f32 %v4033_v52, %v4021_v62 }
 0x224   :  { %v4047_v2 = vadd.f32 %v4046_v61, %v4034_v37 }
 0x226   :  { %v4048_v1 = vpop.f32.mrf.mxu0 }
 0x229   :  { %v4035_v0 = vpop.f32.mrf.mxu3 }
 0x22d   :  { %v4059_v3 = vpop.f32.mrf.mxu1 }
 0x22e   :  { %v4060_v4 = vadd.f32 %v4059_v3, %v4047_v2 }
 0x230   :  { %4063 = vst [vmem:[#allocation2] sm:$0x3] %v4060_v4  ;;  %4100 = vmatmul.f32.vlgmr.msra.gmra.mxu2 %v4060_v4 }
 0x231   :  { %4118 = dma.vmem_to_hbm [thread:$0]  %s4114_s23, 32, %s4116_s25, [#allocation3]  }
 0x235   :  { %v4061_v5 = vpop.f32.mrf.mxu1 }
 0x2b3   :  { %v4101_v9 = vpop.f32.mrf.mxu2 }
 0x2b4   :  { %v4102_v11 = vadd.f32 %v6084_v8, %v4101_v9 }
 0x2b6   :  { %4105 = vst.msk [vmem:[#allocation4] sm:$0x3] %vm4104_vm3, %v4102_v11 }
 0x2b7   :  { %4129 = dma.vmem_to_hbm [thread:$0]  %s4125_s29, 32, %s4127_s12, [#allocation5]  }
 0x2b8   :  { %6133 = dma.done.wait [#allocation3], 32  }
 0x2b9   :  { %6134 = vsyncadd [#allocation3], 4294967264 }
 0x2ba   :  { %6135 = dma.done.wait [#allocation5], 32  }
 0x2bb   :  { %6136 = vsyncadd [#allocation5], 4294967264 }
 0x2bc   :  { %4140 = vsyncpa [#allocation3], 1 }
 0x2bd   :  { %4141 = vsyncpa [#allocation5], 1 }

</bundles_post_ra>
